<compile_context>
chip_gen: v6e
topology: v6e:2x2x1
jax: 0.10.0
libtpu: 0.0.40
codegen_flags: <defaults>
</compile_context>

<pallas_src>
import functools

import jax
import jax.numpy as jnp
import numpy as np
from jax.experimental import pallas as pl
from jax.experimental.pallas import tpu as pltpu

LN_EPS = 1e-6


def _mha4_kernel(q_ref, qz_ref, k_ref, kz_ref, v_ref,
                 wq_ref, wk_ref, wv_ref, wfc_ref,
                 gamma_ref, beta_ref, out_ref, o_scr,
                 *, b_blk, seq_len, n_head, d_k, d_v):
    """One grid step handles b_blk batch elements (rows = b_blk * seq_len)."""
    rows = b_blk * seq_len
    hv = n_head * d_v

    gamma = gamma_ref[...]          # (1, D) f32
    beta = beta_ref[...]            # (1, D) f32

    # ---- LayerNorm per input (f32 stats) feeding straight into its bf16
    # projection — no stacked concat, no cross-tensor slicing afterwards. -----
    def layernorm_bf16(x):
        x = x.astype(jnp.float32)
        mu = jnp.mean(x, axis=-1, keepdims=True)
        xc = x - mu
        var = jnp.mean(xc * xc, axis=-1, keepdims=True)
        return (xc * jax.lax.rsqrt(var + LN_EPS) * gamma + beta).astype(jnp.bfloat16)

    def project(x_ref, w_ref):
        return jnp.dot(layernorm_bf16(x_ref[...]), w_ref[...],
                       preferred_element_type=jnp.float32).astype(jnp.bfloat16)

    # q/qz share W_q, k/kz share W_k (matches torch forward).  The 1/sqrt(d_k)
    # softmax temperature is already folded into W_q by the wrapper.
    q_p = project(q_ref, wq_ref)     # (rows, H*d_k) bf16
    qz_p = project(qz_ref, wq_ref)
    k_p = project(k_ref, wk_ref)
    kz_p = project(kz_ref, wk_ref)
    v_p = project(v_ref, wv_ref)     # (rows, H*d_v) bf16

    def attend(qh, kh, vh):
        # Scores / softmax statistics in f32, probs and PV operands in bf16.
        s = jnp.einsum('bqd,bkd->bqk', qh, kh,
                       preferred_element_type=jnp.float32)       # (b, L, L)
        m = jnp.max(s, axis=-1, keepdims=True)
        p = jnp.exp(s - m)
        denom = jnp.sum(p, axis=-1, keepdims=True)
        p = (p * pl.reciprocal(denom, approx=True)).astype(jnp.bfloat16)
        # TODO(synk): attention-weight dropout is identity (eval mode); only
        # the mask=None path of the module is implemented.
        return jnp.einsum('bqk,bkd->bqd', p, vh,
                          preferred_element_type=jnp.float32)    # (b, L, d_v)

    # Per-head loop.  Each head's result is stored immediately into the VMEM
    # scratch at its static lane offset, bounding live ranges.  V is reused by
    # both paths (no duplication).  Column layout matches wfc = [W_fc1; W_fc2]:
    #   [ SA head 0 .. SA head H-1 | ZA head 0 .. ZA head H-1 ].
    # (A fully head-batched relayout + single batched einsum is a possible
    # further step for configs with many heads and d_k < 128.)
    for h in range(n_head):
        ck = slice(h * d_k, (h + 1) * d_k)
        cv = slice(h * d_v, (h + 1) * d_v)
        vh = v_p[:, cv].reshape(b_blk, seq_len, d_v)

        o1 = attend(q_p[:, ck].reshape(b_blk, seq_len, d_k),
                    k_p[:, ck].reshape(b_blk, seq_len, d_k), vh)
        o_scr[:, h * d_v:(h + 1) * d_v] = o1.reshape(rows, d_v).astype(jnp.bfloat16)

        o2 = attend(qz_p[:, ck].reshape(b_blk, seq_len, d_k),
                    kz_p[:, ck].reshape(b_blk, seq_len, d_k), vh)
        o_scr[:, hv + h * d_v:hv + (h + 1) * d_v] = (
            o2.reshape(rows, d_v).astype(jnp.bfloat16))

    # Fused output projection: fc1(o1) + fc2(o2) = [o1|o2] @ [[W_fc1],[W_fc2]].
    fc = jnp.dot(o_scr[...], wfc_ref[...], preferred_element_type=jnp.float32)

    # v_out = (fc1(o1) + residual) + (fc2(o2) + residual);  residual (= v) is
    # the pre-LayerNorm v, kept in f32.
    out_ref[...] = (fc + 2.0 * v_ref[...].astype(jnp.float32)).astype(out_ref.dtype)


def _choose_b_blk(B, L, D, hk, hv, out_bytes, budget_bytes):
    """Pick the batch block per grid step from a VMEM budget.

    Preference order: fits the budget -> bf16-sublane-aligned row block
    (rows % 16 == 0) -> grid >= 2 (keeps both TensorCores of dual-core parts
    busy) -> largest block (amortises per-grid-step overhead, fills MXU rows).
    """
    def est_block_bytes(b):
        rows = b * L
        bts = 4 * rows * D * 2 * 2          # q/qz/k/kz bf16 blocks, double buffered
        bts += rows * D * 4 * 2             # v block (f32: doubles as residual)
        bts += rows * D * out_bytes * 2     # output block, double buffered
        bts += rows * 2 * hv * 2            # bf16 head-output scratch
        bts += rows * (4 * hk + hv) * 2     # bf16 projected q/qz/k/kz/v
        bts += 3 * rows * D * 4             # LN temporaries / fc accumulator (f32)
        bts += 4 * b * L * L * 4            # live per-head score/prob tiles (f32)
        return bts

    weight_bytes = (2 * D * hk + D * hv + 2 * hv * D) * 2 * 2 + 2 * D * 4 * 2

    divisors = [d for d in range(1, B + 1) if B % d == 0]
    fitting = [d for d in divisors
               if weight_bytes + est_block_bytes(d) <= budget_bytes]
    if not fitting:
        # TODO(synk): tile the sequence / feature dims when even a single
        # batch element overflows the VMEM budget.
        fitting = [1]
    aligned = [d for d in fitting if (d * L) % 16 == 0] or fitting
    multi = [d for d in aligned if B // d >= 2] or aligned
    return max(multi)


def mha4_forward(qz, kz, q, k, v, params, *, n_head, d_k, d_v, b_blk=None,
                 out_dtype=jnp.float32):
    """Fused MultiHeadAttention4 forward (eval mode, mask=None).

    Use out_dtype=jnp.bfloat16 to halve HBM writeback on bandwidth-poor parts
    (e.g. v5e) when the consumer tolerates a bf16 output.
    """
    B, L, D = q.shape
    wq, wk, wv, wfc1, wfc2, gamma, beta = params
    hk, hv = n_head * d_k, n_head * d_v
    out_bytes = jnp.dtype(out_dtype).itemsize

    # ---- generation-aware VMEM budget (v5e/v6e 128 MiB, v7x 64 MiB) --------
    try:
        vmem_cap = int(pltpu.get_tpu_info().vmem_capacity_bytes)
    except Exception:
        vmem_cap = 64 * 1024 * 1024          # conservative (v7x-sized) fallback
    vmem_limit = min(int(vmem_cap * 0.7), 100 * 1024 * 1024)

    if b_blk is None:
        b_blk = _choose_b_blk(B, L, D, hk, hv, out_bytes,
                              int(vmem_limit * 0.85))
    assert B % b_blk == 0
    rows_blk = b_blk * L
    grid = (B // b_blk,)

    f16 = lambda a: a.astype(jnp.bfloat16)
    # Fold the softmax temperature into W_q (shared by both paths) and fuse
    # fc1/fc2 into a single stacked weight [W_fc1; W_fc2].
    wq_s = f16(wq * (1.0 / np.sqrt(d_k)))
    wfc = f16(jnp.concatenate([wfc1, wfc2], axis=0))       # (2*HV, D)

    seq_spec = pl.BlockSpec((rows_blk, D), lambda i: (i, 0))
    w_spec = lambda shape: pl.BlockSpec(shape, lambda i: (0, 0))

    kernel = functools.partial(_mha4_kernel, b_blk=b_blk, seq_len=L,
                               n_head=n_head, d_k=d_k, d_v=d_v)

    out = pl.pallas_call(
        kernel,
        out_shape=jax.ShapeDtypeStruct((B * L, D), out_dtype),
        grid=grid,
        in_specs=[seq_spec] * 5 + [
            w_spec((D, hk)), w_spec((D, hk)), w_spec((D, hv)),
            w_spec((2 * hv, D)),
            w_spec((1, D)), w_spec((1, D)),
        ],
        out_specs=seq_spec,
        scratch_shapes=[pltpu.VMEM((rows_blk, 2 * hv), jnp.bfloat16)],
        compiler_params=pltpu.CompilerParams(
            dimension_semantics=("parallel",),
            vmem_limit_bytes=vmem_limit),
    )(f16(q.reshape(B * L, D)), f16(qz.reshape(B * L, D)),
      f16(k.reshape(B * L, D)), f16(kz.reshape(B * L, D)),
      v.reshape(B * L, D).astype(jnp.float32),   # f32: doubles as the residual
      wq_s, f16(wk), f16(wv), wfc,
      gamma.reshape(1, D).astype(jnp.float32),
      beta.reshape(1, D).astype(jnp.float32))

    return out.reshape(B, L, D)


def mha4_reference(qz, kz, q, k, v, params, *, n_head, d_k, d_v):
    """Plain-JAX f32 reference of the PyTorch forward (dropout = identity)."""
    wq, wk, wv, wfc1, wfc2, gamma, beta = params
    B, Lq, D = q.shape

    def ln(x):
        mu = jnp.mean(x, axis=-1, keepdims=True)
        var = jnp.mean((x - mu) ** 2, axis=-1, keepdims=True)
        return (x - mu) * jax.lax.rsqrt(var + LN_EPS) * gamma[0] + beta[0]

    residual = v
    qn, kn, qzn, kzn, vn = ln(q), ln(k), ln(qz), ln(kz), ln(v)

    def heads(x, w, d):
        y = jnp.einsum("bld,do->blo", x, w)
        return y.reshape(B, -1, n_head, d).transpose(0, 2, 1, 3)

    qh = heads(qn, wq, d_k)
    kh = heads(kn, wk, d_k)
    qzh = heads(qzn, wq, d_k)
    kzh = heads(kzn, wk, d_k)
    vh = heads(vn, wv, d_v)

    def attn(qq, kk):
        s = jnp.einsum("bhqd,bhkd->bhqk", qq, kk) / (d_k ** 0.5)
        p = jax.nn.softmax(s, axis=-1)
        return jnp.einsum("bhqk,bhkd->bhqd", p, vh)

    o1 = attn(qh, kh).transpose(0, 2, 1, 3).reshape(B, Lq, -1)
    o2 = attn(qzh, kzh).transpose(0, 2, 1, 3).reshape(B, Lq, -1)
    v1 = jnp.einsum("blo,od->bld", o1, wfc1) + residual
    v2 = jnp.einsum("blo,od->bld", o2, wfc2) + residual
    return v1 + v2


if __name__ == "__main__":
    # Small shapes consistent with the module: n_head*d_k == n_head*d_v == d_model
    B, L = 2, 8
    n_head, d_k, d_v, d_model = 4, 8, 8, 32

    key = jax.random.PRNGKey(0)
    keys = jax.random.split(key, 12)

    qz = jax.random.normal(keys[0], (B, L, d_model), jnp.float32)
    kz = jax.random.normal(keys[1], (B, L, d_model), jnp.float32)
    q = jax.random.normal(keys[2], (B, L, d_model), jnp.float32)
    k = jax.random.normal(keys[3], (B, L, d_model), jnp.float32)
    v = jax.random.normal(keys[4], (B, L, d_model), jnp.float32)

    scale = 1.0 / np.sqrt(d_model)
    wq = jax.random.normal(keys[5], (d_model, n_head * d_k), jnp.float32) * scale
    wk = jax.random.normal(keys[6], (d_model, n_head * d_k), jnp.float32) * scale
    wv = jax.random.normal(keys[7], (d_model, n_head * d_v), jnp.float32) * scale
    wfc1 = jax.random.normal(keys[8], (n_head * d_v, d_model), jnp.float32) * scale
    wfc2 = jax.random.normal(keys[9], (n_head * d_v, d_model), jnp.float32) * scale
    gamma = 1.0 + 0.1 * jax.random.normal(keys[10], (1, d_model), jnp.float32)
    beta = 0.1 * jax.random.normal(keys[11], (1, d_model), jnp.float32)

    params = (wq, wk, wv, wfc1, wfc2, gamma, beta)

    out = mha4_forward(qz, kz, q, k, v, params, n_head=n_head, d_k=d_k, d_v=d_v)
    out = jax.block_until_ready(out)

    ref = mha4_reference(qz, kz, q, k, v, params, n_head=n_head, d_k=d_k, d_v=d_v)
    ref = jax.block_until_ready(ref)

    # bf16 matmul operands / inputs vs. pure-f32 reference -> slightly looser tol.
    np.testing.assert_allclose(np.asarray(out), np.asarray(ref),
                               rtol=3e-2, atol=3e-2)
    print("KERNEL_OK")
</pallas_src>

<mosaic_0001>
module attributes {stable_mosaic.version = 11 : i64} {
  func.func @_mha4_kernel(%arg0: i32, %arg1: memref<16x32xbf16, #tpu.memory_space<vmem>>, %arg2: memref<16x32xbf16, #tpu.memory_space<vmem>>, %arg3: memref<16x32xbf16, #tpu.memory_space<vmem>>, %arg4: memref<16x32xbf16, #tpu.memory_space<vmem>>, %arg5: memref<16x32xf32, #tpu.memory_space<vmem>>, %arg6: memref<32x32xbf16, #tpu.memory_space<vmem>>, %arg7: memref<32x32xbf16, #tpu.memory_space<vmem>>, %arg8: memref<32x32xbf16, #tpu.memory_space<vmem>>, %arg9: memref<64x32xbf16, #tpu.memory_space<vmem>>, %arg10: memref<1x32xf32, #tpu.memory_space<vmem>>, %arg11: memref<1x32xf32, #tpu.memory_space<vmem>>, %arg12: memref<16x32xf32, #tpu.memory_space<vmem>>, %arg13: memref<16x64xbf16, #tpu.memory_space<vmem>>) attributes {dimension_semantics = [#tpu.dimension_semantics<parallel>], iteration_bounds = array<i64: 1>, scalar_prefetch = 0 : i64, scratch_operands = 1 : i64, tpu.core_type = #tpu.core_type<tc>, window_params = [{transform_indices = @transform_0, window_bounds = array<i64: 16, 32>}, {transform_indices = @transform_1, window_bounds = array<i64: 16, 32>}, {transform_indices = @transform_2, window_bounds = array<i64: 16, 32>}, {transform_indices = @transform_3, window_bounds = array<i64: 16, 32>}, {transform_indices = @transform_4, window_bounds = array<i64: 16, 32>}, {pipeline_mode = #tpu.pipeline_mode<synchronous>, transform_indices = @transform_5, window_bounds = array<i64: 32, 32>}, {pipeline_mode = #tpu.pipeline_mode<synchronous>, transform_indices = @transform_6, window_bounds = array<i64: 32, 32>}, {pipeline_mode = #tpu.pipeline_mode<synchronous>, transform_indices = @transform_7, window_bounds = array<i64: 32, 32>}, {pipeline_mode = #tpu.pipeline_mode<synchronous>, transform_indices = @transform_8, window_bounds = array<i64: 64, 32>}, {pipeline_mode = #tpu.pipeline_mode<synchronous>, transform_indices = @transform_9, window_bounds = array<i64: 1, 32>}, {pipeline_mode = #tpu.pipeline_mode<synchronous>, transform_indices = @transform_10, window_bounds = array<i64: 1, 32>}, {transform_indices = @transform_11, window_bounds = array<i64: 16, 32>}]} {
    %c0 = arith.constant 0 : index
    %c0_0 = arith.constant 0 : index
    %0 = vector.load %arg10[%c0, %c0_0] : memref<1x32xf32, #tpu.memory_space<vmem>>, vector<1x32xf32>
    %c0_1 = arith.constant 0 : index
    %c0_2 = arith.constant 0 : index
    %1 = vector.load %arg11[%c0_1, %c0_2] : memref<1x32xf32, #tpu.memory_space<vmem>>, vector<1x32xf32>
    %c0_3 = arith.constant 0 : index
    %c0_4 = arith.constant 0 : index
    %2 = vector.load %arg1[%c0_3, %c0_4] : memref<16x32xbf16, #tpu.memory_space<vmem>>, vector<16x32xbf16>
    %3 = arith.extf %2 : vector<16x32xbf16> to vector<16x32xf32>
    %cst = arith.constant dense<0.000000e+00> : vector<16xf32>
    %4 = vector.multi_reduction <add>, %3, %cst [1] : vector<16x32xf32> to vector<16xf32>
    %5 = vector.shape_cast %4 : vector<16xf32> to vector<16x1xf32>
    %cst_5 = arith.constant 3.200000e+01 : f32
    %6 = vector.broadcast %cst_5 : f32 to vector<16x1xf32>
    %7 = arith.divf %5, %6 : vector<16x1xf32>
    %8 = vector.broadcast %7 : vector<16x1xf32> to vector<16x32xf32>
    %9 = arith.subf %3, %8 : vector<16x32xf32>
    %10 = arith.mulf %9, %9 : vector<16x32xf32>
    %cst_6 = arith.constant dense<0.000000e+00> : vector<16xf32>
    %11 = vector.multi_reduction <add>, %10, %cst_6 [1] : vector<16x32xf32> to vector<16xf32>
    %12 = vector.shape_cast %11 : vector<16xf32> to vector<16x1xf32>
    %cst_7 = arith.constant 3.200000e+01 : f32
    %13 = vector.broadcast %cst_7 : f32 to vector<16x1xf32>
    %14 = arith.divf %12, %13 : vector<16x1xf32>
    %cst_8 = arith.constant 9.99999997E-7 : f32
    %15 = vector.broadcast %cst_8 : f32 to vector<16x1xf32>
    %16 = arith.addf %14, %15 : vector<16x1xf32>
    %17 = math.rsqrt %16 : vector<16x1xf32>
    %18 = vector.broadcast %17 : vector<16x1xf32> to vector<16x32xf32>
    %19 = arith.mulf %9, %18 : vector<16x32xf32>
    %20 = vector.broadcast %0 : vector<1x32xf32> to vector<16x32xf32>
    %21 = arith.mulf %19, %20 : vector<16x32xf32>
    %22 = vector.broadcast %1 : vector<1x32xf32> to vector<16x32xf32>
    %23 = arith.addf %21, %22 : vector<16x32xf32>
    %24 = arith.truncf %23 : vector<16x32xf32> to vector<16x32xbf16>
    %c0_9 = arith.constant 0 : index
    %c0_10 = arith.constant 0 : index
    %25 = vector.load %arg6[%c0_9, %c0_10] : memref<32x32xbf16, #tpu.memory_space<vmem>>, vector<32x32xbf16>
    %cst_11 = arith.constant dense<0.000000e+00> : vector<16x32xf32>
    %26 = tpu.matmul %24, %25, %cst_11 {dimension_numbers = #tpu.dot_dimension_numbers<[1], [0], [0], [1], [0, 0, 1, 1], [], []>} : vector<16x32xbf16>, vector<32x32xbf16>, vector<16x32xf32> -> vector<16x32xf32>
    %27 = arith.truncf %26 : vector<16x32xf32> to vector<16x32xbf16>
    %c0_12 = arith.constant 0 : index
    %c0_13 = arith.constant 0 : index
    %28 = vector.load %arg2[%c0_12, %c0_13] : memref<16x32xbf16, #tpu.memory_space<vmem>>, vector<16x32xbf16>
    %29 = arith.extf %28 : vector<16x32xbf16> to vector<16x32xf32>
    %cst_14 = arith.constant dense<0.000000e+00> : vector<16xf32>
    %30 = vector.multi_reduction <add>, %29, %cst_14 [1] : vector<16x32xf32> to vector<16xf32>
    %31 = vector.shape_cast %30 : vector<16xf32> to vector<16x1xf32>
    %cst_15 = arith.constant 3.200000e+01 : f32
    %32 = vector.broadcast %cst_15 : f32 to vector<16x1xf32>
    %33 = arith.divf %31, %32 : vector<16x1xf32>
    %34 = vector.broadcast %33 : vector<16x1xf32> to vector<16x32xf32>
    %35 = arith.subf %29, %34 : vector<16x32xf32>
    %36 = arith.mulf %35, %35 : vector<16x32xf32>
    %cst_16 = arith.constant dense<0.000000e+00> : vector<16xf32>
    %37 = vector.multi_reduction <add>, %36, %cst_16 [1] : vector<16x32xf32> to vector<16xf32>
    %38 = vector.shape_cast %37 : vector<16xf32> to vector<16x1xf32>
    %cst_17 = arith.constant 3.200000e+01 : f32
    %39 = vector.broadcast %cst_17 : f32 to vector<16x1xf32>
    %40 = arith.divf %38, %39 : vector<16x1xf32>
    %cst_18 = arith.constant 9.99999997E-7 : f32
    %41 = vector.broadcast %cst_18 : f32 to vector<16x1xf32>
    %42 = arith.addf %40, %41 : vector<16x1xf32>
    %43 = math.rsqrt %42 : vector<16x1xf32>
    %44 = vector.broadcast %43 : vector<16x1xf32> to vector<16x32xf32>
    %45 = arith.mulf %35, %44 : vector<16x32xf32>
    %46 = vector.broadcast %0 : vector<1x32xf32> to vector<16x32xf32>
    %47 = arith.mulf %45, %46 : vector<16x32xf32>
    %48 = vector.broadcast %1 : vector<1x32xf32> to vector<16x32xf32>
    %49 = arith.addf %47, %48 : vector<16x32xf32>
    %50 = arith.truncf %49 : vector<16x32xf32> to vector<16x32xbf16>
    %c0_19 = arith.constant 0 : index
    %c0_20 = arith.constant 0 : index
    %51 = vector.load %arg6[%c0_19, %c0_20] : memref<32x32xbf16, #tpu.memory_space<vmem>>, vector<32x32xbf16>
    %cst_21 = arith.constant dense<0.000000e+00> : vector<16x32xf32>
    %52 = tpu.matmul %50, %51, %cst_21 {dimension_numbers = #tpu.dot_dimension_numbers<[1], [0], [0], [1], [0, 0, 1, 1], [], []>} : vector<16x32xbf16>, vector<32x32xbf16>, vector<16x32xf32> -> vector<16x32xf32>
    %53 = arith.truncf %52 : vector<16x32xf32> to vector<16x32xbf16>
    %c0_22 = arith.constant 0 : index
    %c0_23 = arith.constant 0 : index
    %54 = vector.load %arg3[%c0_22, %c0_23] : memref<16x32xbf16, #tpu.memory_space<vmem>>, vector<16x32xbf16>
    %55 = arith.extf %54 : vector<16x32xbf16> to vector<16x32xf32>
    %cst_24 = arith.constant dense<0.000000e+00> : vector<16xf32>
    %56 = vector.multi_reduction <add>, %55, %cst_24 [1] : vector<16x32xf32> to vector<16xf32>
    %57 = vector.shape_cast %56 : vector<16xf32> to vector<16x1xf32>
    %cst_25 = arith.constant 3.200000e+01 : f32
    %58 = vector.broadcast %cst_25 : f32 to vector<16x1xf32>
    %59 = arith.divf %57, %58 : vector<16x1xf32>
    %60 = vector.broadcast %59 : vector<16x1xf32> to vector<16x32xf32>
    %61 = arith.subf %55, %60 : vector<16x32xf32>
    %62 = arith.mulf %61, %61 : vector<16x32xf32>
    %cst_26 = arith.constant dense<0.000000e+00> : vector<16xf32>
    %63 = vector.multi_reduction <add>, %62, %cst_26 [1] : vector<16x32xf32> to vector<16xf32>
    %64 = vector.shape_cast %63 : vector<16xf32> to vector<16x1xf32>
    %cst_27 = arith.constant 3.200000e+01 : f32
    %65 = vector.broadcast %cst_27 : f32 to vector<16x1xf32>
    %66 = arith.divf %64, %65 : vector<16x1xf32>
    %cst_28 = arith.constant 9.99999997E-7 : f32
    %67 = vector.broadcast %cst_28 : f32 to vector<16x1xf32>
    %68 = arith.addf %66, %67 : vector<16x1xf32>
    %69 = math.rsqrt %68 : vector<16x1xf32>
    %70 = vector.broadcast %69 : vector<16x1xf32> to vector<16x32xf32>
    %71 = arith.mulf %61, %70 : vector<16x32xf32>
    %72 = vector.broadcast %0 : vector<1x32xf32> to vector<16x32xf32>
    %73 = arith.mulf %71, %72 : vector<16x32xf32>
    %74 = vector.broadcast %1 : vector<1x32xf32> to vector<16x32xf32>
    %75 = arith.addf %73, %74 : vector<16x32xf32>
    %76 = arith.truncf %75 : vector<16x32xf32> to vector<16x32xbf16>
    %c0_29 = arith.constant 0 : index
    %c0_30 = arith.constant 0 : index
    %77 = vector.load %arg7[%c0_29, %c0_30] : memref<32x32xbf16, #tpu.memory_space<vmem>>, vector<32x32xbf16>
    %cst_31 = arith.constant dense<0.000000e+00> : vector<16x32xf32>
    %78 = tpu.matmul %76, %77, %cst_31 {dimension_numbers = #tpu.dot_dimension_numbers<[1], [0], [0], [1], [0, 0, 1, 1], [], []>} : vector<16x32xbf16>, vector<32x32xbf16>, vector<16x32xf32> -> vector<16x32xf32>
    %79 = arith.truncf %78 : vector<16x32xf32> to vector<16x32xbf16>
    %c0_32 = arith.constant 0 : index
    %c0_33 = arith.constant 0 : index
    %80 = vector.load %arg4[%c0_32, %c0_33] : memref<16x32xbf16, #tpu.memory_space<vmem>>, vector<16x32xbf16>
    %81 = arith.extf %80 : vector<16x32xbf16> to vector<16x32xf32>
    %cst_34 = arith.constant dense<0.000000e+00> : vector<16xf32>
    %82 = vector.multi_reduction <add>, %81, %cst_34 [1] : vector<16x32xf32> to vector<16xf32>
    %83 = vector.shape_cast %82 : vector<16xf32> to vector<16x1xf32>
    %cst_35 = arith.constant 3.200000e+01 : f32
    %84 = vector.broadcast %cst_35 : f32 to vector<16x1xf32>
    %85 = arith.divf %83, %84 : vector<16x1xf32>
    %86 = vector.broadcast %85 : vector<16x1xf32> to vector<16x32xf32>
    %87 = arith.subf %81, %86 : vector<16x32xf32>
    %88 = arith.mulf %87, %87 : vector<16x32xf32>
    %cst_36 = arith.constant dense<0.000000e+00> : vector<16xf32>
    %89 = vector.multi_reduction <add>, %88, %cst_36 [1] : vector<16x32xf32> to vector<16xf32>
    %90 = vector.shape_cast %89 : vector<16xf32> to vector<16x1xf32>
    %cst_37 = arith.constant 3.200000e+01 : f32
    %91 = vector.broadcast %cst_37 : f32 to vector<16x1xf32>
    %92 = arith.divf %90, %91 : vector<16x1xf32>
    %cst_38 = arith.constant 9.99999997E-7 : f32
    %93 = vector.broadcast %cst_38 : f32 to vector<16x1xf32>
    %94 = arith.addf %92, %93 : vector<16x1xf32>
    %95 = math.rsqrt %94 : vector<16x1xf32>
    %96 = vector.broadcast %95 : vector<16x1xf32> to vector<16x32xf32>
    %97 = arith.mulf %87, %96 : vector<16x32xf32>
    %98 = vector.broadcast %0 : vector<1x32xf32> to vector<16x32xf32>
    %99 = arith.mulf %97, %98 : vector<16x32xf32>
    %100 = vector.broadcast %1 : vector<1x32xf32> to vector<16x32xf32>
    %101 = arith.addf %99, %100 : vector<16x32xf32>
    %102 = arith.truncf %101 : vector<16x32xf32> to vector<16x32xbf16>
    %c0_39 = arith.constant 0 : index
    %c0_40 = arith.constant 0 : index
    %103 = vector.load %arg7[%c0_39, %c0_40] : memref<32x32xbf16, #tpu.memory_space<vmem>>, vector<32x32xbf16>
    %cst_41 = arith.constant dense<0.000000e+00> : vector<16x32xf32>
    %104 = tpu.matmul %102, %103, %cst_41 {dimension_numbers = #tpu.dot_dimension_numbers<[1], [0], [0], [1], [0, 0, 1, 1], [], []>} : vector<16x32xbf16>, vector<32x32xbf16>, vector<16x32xf32> -> vector<16x32xf32>
    %105 = arith.truncf %104 : vector<16x32xf32> to vector<16x32xbf16>
    %c0_42 = arith.constant 0 : index
    %c0_43 = arith.constant 0 : index
    %106 = vector.load %arg5[%c0_42, %c0_43] : memref<16x32xf32, #tpu.memory_space<vmem>>, vector<16x32xf32>
    %cst_44 = arith.constant dense<0.000000e+00> : vector<16xf32>
    %107 = vector.multi_reduction <add>, %106, %cst_44 [1] : vector<16x32xf32> to vector<16xf32>
    %108 = vector.shape_cast %107 : vector<16xf32> to vector<16x1xf32>
    %cst_45 = arith.constant 3.200000e+01 : f32
    %109 = vector.broadcast %cst_45 : f32 to vector<16x1xf32>
    %110 = arith.divf %108, %109 : vector<16x1xf32>
    %111 = vector.broadcast %110 : vector<16x1xf32> to vector<16x32xf32>
    %112 = arith.subf %106, %111 : vector<16x32xf32>
    %113 = arith.mulf %112, %112 : vector<16x32xf32>
    %cst_46 = arith.constant dense<0.000000e+00> : vector<16xf32>
    %114 = vector.multi_reduction <add>, %113, %cst_46 [1] : vector<16x32xf32> to vector<16xf32>
    %115 = vector.shape_cast %114 : vector<16xf32> to vector<16x1xf32>
    %cst_47 = arith.constant 3.200000e+01 : f32
    %116 = vector.broadcast %cst_47 : f32 to vector<16x1xf32>
    %117 = arith.divf %115, %116 : vector<16x1xf32>
    %cst_48 = arith.constant 9.99999997E-7 : f32
    %118 = vector.broadcast %cst_48 : f32 to vector<16x1xf32>
    %119 = arith.addf %117, %118 : vector<16x1xf32>
    %120 = math.rsqrt %119 : vector<16x1xf32>
    %121 = vector.broadcast %120 : vector<16x1xf32> to vector<16x32xf32>
    %122 = arith.mulf %112, %121 : vector<16x32xf32>
    %123 = vector.broadcast %0 : vector<1x32xf32> to vector<16x32xf32>
    %124 = arith.mulf %122, %123 : vector<16x32xf32>
    %125 = vector.broadcast %1 : vector<1x32xf32> to vector<16x32xf32>
    %126 = arith.addf %124, %125 : vector<16x32xf32>
    %127 = arith.truncf %126 : vector<16x32xf32> to vector<16x32xbf16>
    %c0_49 = arith.constant 0 : index
    %c0_50 = arith.constant 0 : index
    %128 = vector.load %arg8[%c0_49, %c0_50] : memref<32x32xbf16, #tpu.memory_space<vmem>>, vector<32x32xbf16>
    %cst_51 = arith.constant dense<0.000000e+00> : vector<16x32xf32>
    %129 = tpu.matmul %127, %128, %cst_51 {dimension_numbers = #tpu.dot_dimension_numbers<[1], [0], [0], [1], [0, 0, 1, 1], [], []>} : vector<16x32xbf16>, vector<32x32xbf16>, vector<16x32xf32> -> vector<16x32xf32>
    %130 = arith.truncf %129 : vector<16x32xf32> to vector<16x32xbf16>
    %131 = vector.extract_strided_slice %130 {offsets = [0, 0], sizes = [16, 8], strides = [1, 1]} : vector<16x32xbf16> to vector<16x8xbf16>
    %132 = vector.shape_cast %131 : vector<16x8xbf16> to vector<2x8x8xbf16>
    %133 = vector.extract_strided_slice %27 {offsets = [0, 0], sizes = [16, 8], strides = [1, 1]} : vector<16x32xbf16> to vector<16x8xbf16>
    %134 = vector.shape_cast %133 : vector<16x8xbf16> to vector<2x8x8xbf16>
    %135 = vector.extract_strided_slice %79 {offsets = [0, 0], sizes = [16, 8], strides = [1, 1]} : vector<16x32xbf16> to vector<16x8xbf16>
    %136 = vector.shape_cast %135 : vector<16x8xbf16> to vector<2x8x8xbf16>
    "tpu.trace_start"() <{level = 10 : i32, message = "bqd,bkd->bqk"}> : () -> ()
    %cst_52 = arith.constant dense<0.000000e+00> : vector<2x8x8xf32>
    %137 = tpu.matmul %134, %136, %cst_52 {dimension_numbers = #tpu.dot_dimension_numbers<[2], [2], [1], [1], [0, 0, 0, 1, 1, 1], [0], [0]>} : vector<2x8x8xbf16>, vector<2x8x8xbf16>, vector<2x8x8xf32> -> vector<2x8x8xf32>
    "tpu.trace_stop"() : () -> ()
    %cst_53 = arith.constant dense<0xFF800000> : vector<2x8xf32>
    %138 = vector.multi_reduction <maximumf>, %137, %cst_53 [2] : vector<2x8x8xf32> to vector<2x8xf32>
    %139 = vector.shape_cast %138 : vector<2x8xf32> to vector<2x8x1xf32>
    %140 = vector.broadcast %139 : vector<2x8x1xf32> to vector<2x8x8xf32>
    %141 = arith.subf %137, %140 : vector<2x8x8xf32>
    %142 = math.exp %141 : vector<2x8x8xf32>
    %cst_54 = arith.constant dense<0.000000e+00> : vector<2x8xf32>
    %143 = vector.multi_reduction <add>, %142, %cst_54 [2] : vector<2x8x8xf32> to vector<2x8xf32>
    %144 = vector.shape_cast %143 : vector<2x8xf32> to vector<2x8x1xf32>
    %145 = tpu.reciprocal %144 {approx = true} : vector<2x8x1xf32> -> vector<2x8x1xf32>
    %146 = vector.broadcast %145 : vector<2x8x1xf32> to vector<2x8x8xf32>
    %147 = arith.mulf %142, %146 : vector<2x8x8xf32>
    %148 = arith.truncf %147 : vector<2x8x8xf32> to vector<2x8x8xbf16>
    "tpu.trace_start"() <{level = 10 : i32, message = "bqk,bkd->bqd"}> : () -> ()
    %cst_55 = arith.constant dense<0.000000e+00> : vector<2x8x8xf32>
    %149 = tpu.matmul %148, %132, %cst_55 {dimension_numbers = #tpu.dot_dimension_numbers<[2], [1], [1], [2], [0, 0, 0, 1, 1, 2], [0], [0]>} : vector<2x8x8xbf16>, vector<2x8x8xbf16>, vector<2x8x8xf32> -> vector<2x8x8xf32>
    "tpu.trace_stop"() : () -> ()
    %150 = vector.shape_cast %149 : vector<2x8x8xf32> to vector<16x8xf32>
    %151 = arith.truncf %150 : vector<16x8xf32> to vector<16x8xbf16>
    %c0_56 = arith.constant 0 : index
    %c0_57 = arith.constant 0 : index
    %152 = vector.load %arg13[%c0_56, %c0_57] : memref<16x64xbf16, #tpu.memory_space<vmem>>, vector<16x8xbf16>
    tpu.vector_store %arg13[%c0_56, %c0_57], %151 {strides = array<i32>} : memref<16x64xbf16, #tpu.memory_space<vmem>>, vector<16x8xbf16>,
    %153 = vector.extract_strided_slice %53 {offsets = [0, 0], sizes = [16, 8], strides = [1, 1]} : vector<16x32xbf16> to vector<16x8xbf16>
    %154 = vector.shape_cast %153 : vector<16x8xbf16> to vector<2x8x8xbf16>
    %155 = vector.extract_strided_slice %105 {offsets = [0, 0], sizes = [16, 8], strides = [1, 1]} : vector<16x32xbf16> to vector<16x8xbf16>
    %156 = vector.shape_cast %155 : vector<16x8xbf16> to vector<2x8x8xbf16>
    "tpu.trace_start"() <{level = 10 : i32, message = "bqd,bkd->bqk"}> : () -> ()
    %cst_58 = arith.constant dense<0.000000e+00> : vector<2x8x8xf32>
    %157 = tpu.matmul %154, %156, %cst_58 {dimension_numbers = #tpu.dot_dimension_numbers<[2], [2], [1], [1], [0, 0, 0, 1, 1, 1], [0], [0]>} : vector<2x8x8xbf16>, vector<2x8x8xbf16>, vector<2x8x8xf32> -> vector<2x8x8xf32>
    "tpu.trace_stop"() : () -> ()
    %cst_59 = arith.constant dense<0xFF800000> : vector<2x8xf32>
    %158 = vector.multi_reduction <maximumf>, %157, %cst_59 [2] : vector<2x8x8xf32> to vector<2x8xf32>
    %159 = vector.shape_cast %158 : vector<2x8xf32> to vector<2x8x1xf32>
    %160 = vector.broadcast %159 : vector<2x8x1xf32> to vector<2x8x8xf32>
    %161 = arith.subf %157, %160 : vector<2x8x8xf32>
    %162 = math.exp %161 : vector<2x8x8xf32>
    %cst_60 = arith.constant dense<0.000000e+00> : vector<2x8xf32>
    %163 = vector.multi_reduction <add>, %162, %cst_60 [2] : vector<2x8x8xf32> to vector<2x8xf32>
    %164 = vector.shape_cast %163 : vector<2x8xf32> to vector<2x8x1xf32>
    %165 = tpu.reciprocal %164 {approx = true} : vector<2x8x1xf32> -> vector<2x8x1xf32>
    %166 = vector.broadcast %165 : vector<2x8x1xf32> to vector<2x8x8xf32>
    %167 = arith.mulf %162, %166 : vector<2x8x8xf32>
    %168 = arith.truncf %167 : vector<2x8x8xf32> to vector<2x8x8xbf16>
    "tpu.trace_start"() <{level = 10 : i32, message = "bqk,bkd->bqd"}> : () -> ()
    %cst_61 = arith.constant dense<0.000000e+00> : vector<2x8x8xf32>
    %169 = tpu.matmul %168, %132, %cst_61 {dimension_numbers = #tpu.dot_dimension_numbers<[2], [1], [1], [2], [0, 0, 0, 1, 1, 2], [0], [0]>} : vector<2x8x8xbf16>, vector<2x8x8xbf16>, vector<2x8x8xf32> -> vector<2x8x8xf32>
    "tpu.trace_stop"() : () -> ()
    %170 = vector.shape_cast %169 : vector<2x8x8xf32> to vector<16x8xf32>
    %171 = arith.truncf %170 : vector<16x8xf32> to vector<16x8xbf16>
    %c0_62 = arith.constant 0 : index
    %c32 = arith.constant 32 : index
    %172 = vector.load %arg13[%c0_62, %c32] : memref<16x64xbf16, #tpu.memory_space<vmem>>, vector<16x8xbf16>
    tpu.vector_store %arg13[%c0_62, %c32], %171 {strides = array<i32>} : memref<16x64xbf16, #tpu.memory_space<vmem>>, vector<16x8xbf16>,
    %173 = vector.extract_strided_slice %130 {offsets = [0, 8], sizes = [16, 8], strides = [1, 1]} : vector<16x32xbf16> to vector<16x8xbf16>
    %174 = vector.shape_cast %173 : vector<16x8xbf16> to vector<2x8x8xbf16>
    %175 = vector.extract_strided_slice %27 {offsets = [0, 8], sizes = [16, 8], strides = [1, 1]} : vector<16x32xbf16> to vector<16x8xbf16>
    %176 = vector.shape_cast %175 : vector<16x8xbf16> to vector<2x8x8xbf16>
    %177 = vector.extract_strided_slice %79 {offsets = [0, 8], sizes = [16, 8], strides = [1, 1]} : vector<16x32xbf16> to vector<16x8xbf16>
    %178 = vector.shape_cast %177 : vector<16x8xbf16> to vector<2x8x8xbf16>
    "tpu.trace_start"() <{level = 10 : i32, message = "bqd,bkd->bqk"}> : () -> ()
    %cst_63 = arith.constant dense<0.000000e+00> : vector<2x8x8xf32>
    %179 = tpu.matmul %176, %178, %cst_63 {dimension_numbers = #tpu.dot_dimension_numbers<[2], [2], [1], [1], [0, 0, 0, 1, 1, 1], [0], [0]>} : vector<2x8x8xbf16>, vector<2x8x8xbf16>, vector<2x8x8xf32> -> vector<2x8x8xf32>
    "tpu.trace_stop"() : () -> ()
    %cst_64 = arith.constant dense<0xFF800000> : vector<2x8xf32>
    %180 = vector.multi_reduction <maximumf>, %179, %cst_64 [2] : vector<2x8x8xf32> to vector<2x8xf32>
    %181 = vector.shape_cast %180 : vector<2x8xf32> to vector<2x8x1xf32>
    %182 = vector.broadcast %181 : vector<2x8x1xf32> to vector<2x8x8xf32>
    %183 = arith.subf %179, %182 : vector<2x8x8xf32>
    %184 = math.exp %183 : vector<2x8x8xf32>
    %cst_65 = arith.constant dense<0.000000e+00> : vector<2x8xf32>
    %185 = vector.multi_reduction <add>, %184, %cst_65 [2] : vector<2x8x8xf32> to vector<2x8xf32>
    %186 = vector.shape_cast %185 : vector<2x8xf32> to vector<2x8x1xf32>
    %187 = tpu.reciprocal %186 {approx = true} : vector<2x8x1xf32> -> vector<2x8x1xf32>
    %188 = vector.broadcast %187 : vector<2x8x1xf32> to vector<2x8x8xf32>
    %189 = arith.mulf %184, %188 : vector<2x8x8xf32>
    %190 = arith.truncf %189 : vector<2x8x8xf32> to vector<2x8x8xbf16>
    "tpu.trace_start"() <{level = 10 : i32, message = "bqk,bkd->bqd"}> : () -> ()
    %cst_66 = arith.constant dense<0.000000e+00> : vector<2x8x8xf32>
    %191 = tpu.matmul %190, %174, %cst_66 {dimension_numbers = #tpu.dot_dimension_numbers<[2], [1], [1], [2], [0, 0, 0, 1, 1, 2], [0], [0]>} : vector<2x8x8xbf16>, vector<2x8x8xbf16>, vector<2x8x8xf32> -> vector<2x8x8xf32>
    "tpu.trace_stop"() : () -> ()
    %192 = vector.shape_cast %191 : vector<2x8x8xf32> to vector<16x8xf32>
    %193 = arith.truncf %192 : vector<16x8xf32> to vector<16x8xbf16>
    %c0_67 = arith.constant 0 : index
    %c8 = arith.constant 8 : index
    %194 = vector.load %arg13[%c0_67, %c8] : memref<16x64xbf16, #tpu.memory_space<vmem>>, vector<16x8xbf16>
    tpu.vector_store %arg13[%c0_67, %c8], %193 {strides = array<i32>} : memref<16x64xbf16, #tpu.memory_space<vmem>>, vector<16x8xbf16>,
    %195 = vector.extract_strided_slice %53 {offsets = [0, 8], sizes = [16, 8], strides = [1, 1]} : vector<16x32xbf16> to vector<16x8xbf16>
    %196 = vector.shape_cast %195 : vector<16x8xbf16> to vector<2x8x8xbf16>
    %197 = vector.extract_strided_slice %105 {offsets = [0, 8], sizes = [16, 8], strides = [1, 1]} : vector<16x32xbf16> to vector<16x8xbf16>
    %198 = vector.shape_cast %197 : vector<16x8xbf16> to vector<2x8x8xbf16>
    "tpu.trace_start"() <{level = 10 : i32, message = "bqd,bkd->bqk"}> : () -> ()
    %cst_68 = arith.constant dense<0.000000e+00> : vector<2x8x8xf32>
    %199 = tpu.matmul %196, %198, %cst_68 {dimension_numbers = #tpu.dot_dimension_numbers<[2], [2], [1], [1], [0, 0, 0, 1, 1, 1], [0], [0]>} : vector<2x8x8xbf16>, vector<2x8x8xbf16>, vector<2x8x8xf32> -> vector<2x8x8xf32>
    "tpu.trace_stop"() : () -> ()
    %cst_69 = arith.constant dense<0xFF800000> : vector<2x8xf32>
    %200 = vector.multi_reduction <maximumf>, %199, %cst_69 [2] : vector<2x8x8xf32> to vector<2x8xf32>
    %201 = vector.shape_cast %200 : vector<2x8xf32> to vector<2x8x1xf32>
    %202 = vector.broadcast %201 : vector<2x8x1xf32> to vector<2x8x8xf32>
    %203 = arith.subf %199, %202 : vector<2x8x8xf32>
    %204 = math.exp %203 : vector<2x8x8xf32>
    %cst_70 = arith.constant dense<0.000000e+00> : vector<2x8xf32>
    %205 = vector.multi_reduction <add>, %204, %cst_70 [2] : vector<2x8x8xf32> to vector<2x8xf32>
    %206 = vector.shape_cast %205 : vector<2x8xf32> to vector<2x8x1xf32>
    %207 = tpu.reciprocal %206 {approx = true} : vector<2x8x1xf32> -> vector<2x8x1xf32>
    %208 = vector.broadcast %207 : vector<2x8x1xf32> to vector<2x8x8xf32>
    %209 = arith.mulf %204, %208 : vector<2x8x8xf32>
    %210 = arith.truncf %209 : vector<2x8x8xf32> to vector<2x8x8xbf16>
    "tpu.trace_start"() <{level = 10 : i32, message = "bqk,bkd->bqd"}> : () -> ()
    %cst_71 = arith.constant dense<0.000000e+00> : vector<2x8x8xf32>
    %211 = tpu.matmul %210, %174, %cst_71 {dimension_numbers = #tpu.dot_dimension_numbers<[2], [1], [1], [2], [0, 0, 0, 1, 1, 2], [0], [0]>} : vector<2x8x8xbf16>, vector<2x8x8xbf16>, vector<2x8x8xf32> -> vector<2x8x8xf32>
    "tpu.trace_stop"() : () -> ()
    %212 = vector.shape_cast %211 : vector<2x8x8xf32> to vector<16x8xf32>
    %213 = arith.truncf %212 : vector<16x8xf32> to vector<16x8xbf16>
    %c0_72 = arith.constant 0 : index
    %c40 = arith.constant 40 : index
    %214 = vector.load %arg13[%c0_72, %c40] : memref<16x64xbf16, #tpu.memory_space<vmem>>, vector<16x8xbf16>
    tpu.vector_store %arg13[%c0_72, %c40], %213 {strides = array<i32>} : memref<16x64xbf16, #tpu.memory_space<vmem>>, vector<16x8xbf16>,
    %215 = vector.extract_strided_slice %130 {offsets = [0, 16], sizes = [16, 8], strides = [1, 1]} : vector<16x32xbf16> to vector<16x8xbf16>
    %216 = vector.shape_cast %215 : vector<16x8xbf16> to vector<2x8x8xbf16>
    %217 = vector.extract_strided_slice %27 {offsets = [0, 16], sizes = [16, 8], strides = [1, 1]} : vector<16x32xbf16> to vector<16x8xbf16>
    %218 = vector.shape_cast %217 : vector<16x8xbf16> to vector<2x8x8xbf16>
    %219 = vector.extract_strided_slice %79 {offsets = [0, 16], sizes = [16, 8], strides = [1, 1]} : vector<16x32xbf16> to vector<16x8xbf16>
    %220 = vector.shape_cast %219 : vector<16x8xbf16> to vector<2x8x8xbf16>
    "tpu.trace_start"() <{level = 10 : i32, message = "bqd,bkd->bqk"}> : () -> ()
    %cst_73 = arith.constant dense<0.000000e+00> : vector<2x8x8xf32>
    %221 = tpu.matmul %218, %220, %cst_73 {dimension_numbers = #tpu.dot_dimension_numbers<[2], [2], [1], [1], [0, 0, 0, 1, 1, 1], [0], [0]>} : vector<2x8x8xbf16>, vector<2x8x8xbf16>, vector<2x8x8xf32> -> vector<2x8x8xf32>
    "tpu.trace_stop"() : () -> ()
    %cst_74 = arith.constant dense<0xFF800000> : vector<2x8xf32>
    %222 = vector.multi_reduction <maximumf>, %221, %cst_74 [2] : vector<2x8x8xf32> to vector<2x8xf32>
    %223 = vector.shape_cast %222 : vector<2x8xf32> to vector<2x8x1xf32>
    %224 = vector.broadcast %223 : vector<2x8x1xf32> to vector<2x8x8xf32>
    %225 = arith.subf %221, %224 : vector<2x8x8xf32>
    %226 = math.exp %225 : vector<2x8x8xf32>
    %cst_75 = arith.constant dense<0.000000e+00> : vector<2x8xf32>
    %227 = vector.multi_reduction <add>, %226, %cst_75 [2] : vector<2x8x8xf32> to vector<2x8xf32>
    %228 = vector.shape_cast %227 : vector<2x8xf32> to vector<2x8x1xf32>
    %229 = tpu.reciprocal %228 {approx = true} : vector<2x8x1xf32> -> vector<2x8x1xf32>
    %230 = vector.broadcast %229 : vector<2x8x1xf32> to vector<2x8x8xf32>
    %231 = arith.mulf %226, %230 : vector<2x8x8xf32>
    %232 = arith.truncf %231 : vector<2x8x8xf32> to vector<2x8x8xbf16>
    "tpu.trace_start"() <{level = 10 : i32, message = "bqk,bkd->bqd"}> : () -> ()
    %cst_76 = arith.constant dense<0.000000e+00> : vector<2x8x8xf32>
    %233 = tpu.matmul %232, %216, %cst_76 {dimension_numbers = #tpu.dot_dimension_numbers<[2], [1], [1], [2], [0, 0, 0, 1, 1, 2], [0], [0]>} : vector<2x8x8xbf16>, vector<2x8x8xbf16>, vector<2x8x8xf32> -> vector<2x8x8xf32>
    "tpu.trace_stop"() : () -> ()
    %234 = vector.shape_cast %233 : vector<2x8x8xf32> to vector<16x8xf32>
    %235 = arith.truncf %234 : vector<16x8xf32> to vector<16x8xbf16>
    %c0_77 = arith.constant 0 : index
    %c16 = arith.constant 16 : index
    %236 = vector.load %arg13[%c0_77, %c16] : memref<16x64xbf16, #tpu.memory_space<vmem>>, vector<16x8xbf16>
    tpu.vector_store %arg13[%c0_77, %c16], %235 {strides = array<i32>} : memref<16x64xbf16, #tpu.memory_space<vmem>>, vector<16x8xbf16>,
    %237 = vector.extract_strided_slice %53 {offsets = [0, 16], sizes = [16, 8], strides = [1, 1]} : vector<16x32xbf16> to vector<16x8xbf16>
    %238 = vector.shape_cast %237 : vector<16x8xbf16> to vector<2x8x8xbf16>
    %239 = vector.extract_strided_slice %105 {offsets = [0, 16], sizes = [16, 8], strides = [1, 1]} : vector<16x32xbf16> to vector<16x8xbf16>
    %240 = vector.shape_cast %239 : vector<16x8xbf16> to vector<2x8x8xbf16>
    "tpu.trace_start"() <{level = 10 : i32, message = "bqd,bkd->bqk"}> : () -> ()
    %cst_78 = arith.constant dense<0.000000e+00> : vector<2x8x8xf32>
    %241 = tpu.matmul %238, %240, %cst_78 {dimension_numbers = #tpu.dot_dimension_numbers<[2], [2], [1], [1], [0, 0, 0, 1, 1, 1], [0], [0]>} : vector<2x8x8xbf16>, vector<2x8x8xbf16>, vector<2x8x8xf32> -> vector<2x8x8xf32>
    "tpu.trace_stop"() : () -> ()
    %cst_79 = arith.constant dense<0xFF800000> : vector<2x8xf32>
    %242 = vector.multi_reduction <maximumf>, %241, %cst_79 [2] : vector<2x8x8xf32> to vector<2x8xf32>
    %243 = vector.shape_cast %242 : vector<2x8xf32> to vector<2x8x1xf32>
    %244 = vector.broadcast %243 : vector<2x8x1xf32> to vector<2x8x8xf32>
    %245 = arith.subf %241, %244 : vector<2x8x8xf32>
    %246 = math.exp %245 : vector<2x8x8xf32>
    %cst_80 = arith.constant dense<0.000000e+00> : vector<2x8xf32>
    %247 = vector.multi_reduction <add>, %246, %cst_80 [2] : vector<2x8x8xf32> to vector<2x8xf32>
    %248 = vector.shape_cast %247 : vector<2x8xf32> to vector<2x8x1xf32>
    %249 = tpu.reciprocal %248 {approx = true} : vector<2x8x1xf32> -> vector<2x8x1xf32>
    %250 = vector.broadcast %249 : vector<2x8x1xf32> to vector<2x8x8xf32>
    %251 = arith.mulf %246, %250 : vector<2x8x8xf32>
    %252 = arith.truncf %251 : vector<2x8x8xf32> to vector<2x8x8xbf16>
    "tpu.trace_start"() <{level = 10 : i32, message = "bqk,bkd->bqd"}> : () -> ()
    %cst_81 = arith.constant dense<0.000000e+00> : vector<2x8x8xf32>
    %253 = tpu.matmul %252, %216, %cst_81 {dimension_numbers = #tpu.dot_dimension_numbers<[2], [1], [1], [2], [0, 0, 0, 1, 1, 2], [0], [0]>} : vector<2x8x8xbf16>, vector<2x8x8xbf16>, vector<2x8x8xf32> -> vector<2x8x8xf32>
    "tpu.trace_stop"() : () -> ()
    %254 = vector.shape_cast %253 : vector<2x8x8xf32> to vector<16x8xf32>
    %255 = arith.truncf %254 : vector<16x8xf32> to vector<16x8xbf16>
    %c0_82 = arith.constant 0 : index
    %c48 = arith.constant 48 : index
    %256 = vector.load %arg13[%c0_82, %c48] : memref<16x64xbf16, #tpu.memory_space<vmem>>, vector<16x8xbf16>
    tpu.vector_store %arg13[%c0_82, %c48], %255 {strides = array<i32>} : memref<16x64xbf16, #tpu.memory_space<vmem>>, vector<16x8xbf16>,
    %257 = vector.extract_strided_slice %130 {offsets = [0, 24], sizes = [16, 8], strides = [1, 1]} : vector<16x32xbf16> to vector<16x8xbf16>
    %258 = vector.shape_cast %257 : vector<16x8xbf16> to vector<2x8x8xbf16>
    %259 = vector.extract_strided_slice %27 {offsets = [0, 24], sizes = [16, 8], strides = [1, 1]} : vector<16x32xbf16> to vector<16x8xbf16>
    %260 = vector.shape_cast %259 : vector<16x8xbf16> to vector<2x8x8xbf16>
    %261 = vector.extract_strided_slice %79 {offsets = [0, 24], sizes = [16, 8], strides = [1, 1]} : vector<16x32xbf16> to vector<16x8xbf16>
    %262 = vector.shape_cast %261 : vector<16x8xbf16> to vector<2x8x8xbf16>
    "tpu.trace_start"() <{level = 10 : i32, message = "bqd,bkd->bqk"}> : () -> ()
    %cst_83 = arith.constant dense<0.000000e+00> : vector<2x8x8xf32>
    %263 = tpu.matmul %260, %262, %cst_83 {dimension_numbers = #tpu.dot_dimension_numbers<[2], [2], [1], [1], [0, 0, 0, 1, 1, 1], [0], [0]>} : vector<2x8x8xbf16>, vector<2x8x8xbf16>, vector<2x8x8xf32> -> vector<2x8x8xf32>
    "tpu.trace_stop"() : () -> ()
    %cst_84 = arith.constant dense<0xFF800000> : vector<2x8xf32>
    %264 = vector.multi_reduction <maximumf>, %263, %cst_84 [2] : vector<2x8x8xf32> to vector<2x8xf32>
    %265 = vector.shape_cast %264 : vector<2x8xf32> to vector<2x8x1xf32>
    %266 = vector.broadcast %265 : vector<2x8x1xf32> to vector<2x8x8xf32>
    %267 = arith.subf %263, %266 : vector<2x8x8xf32>
    %268 = math.exp %267 : vector<2x8x8xf32>
    %cst_85 = arith.constant dense<0.000000e+00> : vector<2x8xf32>
    %269 = vector.multi_reduction <add>, %268, %cst_85 [2] : vector<2x8x8xf32> to vector<2x8xf32>
    %270 = vector.shape_cast %269 : vector<2x8xf32> to vector<2x8x1xf32>
    %271 = tpu.reciprocal %270 {approx = true} : vector<2x8x1xf32> -> vector<2x8x1xf32>
    %272 = vector.broadcast %271 : vector<2x8x1xf32> to vector<2x8x8xf32>
    %273 = arith.mulf %268, %272 : vector<2x8x8xf32>
    %274 = arith.truncf %273 : vector<2x8x8xf32> to vector<2x8x8xbf16>
    "tpu.trace_start"() <{level = 10 : i32, message = "bqk,bkd->bqd"}> : () -> ()
    %cst_86 = arith.constant dense<0.000000e+00> : vector<2x8x8xf32>
    %275 = tpu.matmul %274, %258, %cst_86 {dimension_numbers = #tpu.dot_dimension_numbers<[2], [1], [1], [2], [0, 0, 0, 1, 1, 2], [0], [0]>} : vector<2x8x8xbf16>, vector<2x8x8xbf16>, vector<2x8x8xf32> -> vector<2x8x8xf32>
    "tpu.trace_stop"() : () -> ()
    %276 = vector.shape_cast %275 : vector<2x8x8xf32> to vector<16x8xf32>
    %277 = arith.truncf %276 : vector<16x8xf32> to vector<16x8xbf16>
    %c0_87 = arith.constant 0 : index
    %c24 = arith.constant 24 : index
    %278 = vector.load %arg13[%c0_87, %c24] : memref<16x64xbf16, #tpu.memory_space<vmem>>, vector<16x8xbf16>
    tpu.vector_store %arg13[%c0_87, %c24], %277 {strides = array<i32>} : memref<16x64xbf16, #tpu.memory_space<vmem>>, vector<16x8xbf16>,
    %279 = vector.extract_strided_slice %53 {offsets = [0, 24], sizes = [16, 8], strides = [1, 1]} : vector<16x32xbf16> to vector<16x8xbf16>
    %280 = vector.shape_cast %279 : vector<16x8xbf16> to vector<2x8x8xbf16>
    %281 = vector.extract_strided_slice %105 {offsets = [0, 24], sizes = [16, 8], strides = [1, 1]} : vector<16x32xbf16> to vector<16x8xbf16>
    %282 = vector.shape_cast %281 : vector<16x8xbf16> to vector<2x8x8xbf16>
    "tpu.trace_start"() <{level = 10 : i32, message = "bqd,bkd->bqk"}> : () -> ()
    %cst_88 = arith.constant dense<0.000000e+00> : vector<2x8x8xf32>
    %283 = tpu.matmul %280, %282, %cst_88 {dimension_numbers = #tpu.dot_dimension_numbers<[2], [2], [1], [1], [0, 0, 0, 1, 1, 1], [0], [0]>} : vector<2x8x8xbf16>, vector<2x8x8xbf16>, vector<2x8x8xf32> -> vector<2x8x8xf32>
    "tpu.trace_stop"() : () -> ()
    %cst_89 = arith.constant dense<0xFF800000> : vector<2x8xf32>
    %284 = vector.multi_reduction <maximumf>, %283, %cst_89 [2] : vector<2x8x8xf32> to vector<2x8xf32>
    %285 = vector.shape_cast %284 : vector<2x8xf32> to vector<2x8x1xf32>
    %286 = vector.broadcast %285 : vector<2x8x1xf32> to vector<2x8x8xf32>
    %287 = arith.subf %283, %286 : vector<2x8x8xf32>
    %288 = math.exp %287 : vector<2x8x8xf32>
    %cst_90 = arith.constant dense<0.000000e+00> : vector<2x8xf32>
    %289 = vector.multi_reduction <add>, %288, %cst_90 [2] : vector<2x8x8xf32> to vector<2x8xf32>
    %290 = vector.shape_cast %289 : vector<2x8xf32> to vector<2x8x1xf32>
    %291 = tpu.reciprocal %290 {approx = true} : vector<2x8x1xf32> -> vector<2x8x1xf32>
    %292 = vector.broadcast %291 : vector<2x8x1xf32> to vector<2x8x8xf32>
    %293 = arith.mulf %288, %292 : vector<2x8x8xf32>
    %294 = arith.truncf %293 : vector<2x8x8xf32> to vector<2x8x8xbf16>
    "tpu.trace_start"() <{level = 10 : i32, message = "bqk,bkd->bqd"}> : () -> ()
    %cst_91 = arith.constant dense<0.000000e+00> : vector<2x8x8xf32>
    %295 = tpu.matmul %294, %258, %cst_91 {dimension_numbers = #tpu.dot_dimension_numbers<[2], [1], [1], [2], [0, 0, 0, 1, 1, 2], [0], [0]>} : vector<2x8x8xbf16>, vector<2x8x8xbf16>, vector<2x8x8xf32> -> vector<2x8x8xf32>
    "tpu.trace_stop"() : () -> ()
    %296 = vector.shape_cast %295 : vector<2x8x8xf32> to vector<16x8xf32>
    %297 = arith.truncf %296 : vector<16x8xf32> to vector<16x8xbf16>
    %c0_92 = arith.constant 0 : index
    %c56 = arith.constant 56 : index
    %298 = vector.load %arg13[%c0_92, %c56] : memref<16x64xbf16, #tpu.memory_space<vmem>>, vector<16x8xbf16>
    tpu.vector_store %arg13[%c0_92, %c56], %297 {strides = array<i32>} : memref<16x64xbf16, #tpu.memory_space<vmem>>, vector<16x8xbf16>,
    %c0_93 = arith.constant 0 : index
    %c0_94 = arith.constant 0 : index
    %299 = vector.load %arg13[%c0_93, %c0_94] : memref<16x64xbf16, #tpu.memory_space<vmem>>, vector<16x64xbf16>
    %c0_95 = arith.constant 0 : index
    %c0_96 = arith.constant 0 : index
    %300 = vector.load %arg9[%c0_95, %c0_96] : memref<64x32xbf16, #tpu.memory_space<vmem>>, vector<64x32xbf16>
    %cst_97 = arith.constant dense<0.000000e+00> : vector<16x32xf32>
    %301 = tpu.matmul %299, %300, %cst_97 {dimension_numbers = #tpu.dot_dimension_numbers<[1], [0], [0], [1], [0, 0, 1, 1], [], []>} : vector<16x64xbf16>, vector<64x32xbf16>, vector<16x32xf32> -> vector<16x32xf32>
    %c0_98 = arith.constant 0 : index
    %c0_99 = arith.constant 0 : index
    %302 = vector.load %arg5[%c0_98, %c0_99] : memref<16x32xf32, #tpu.memory_space<vmem>>, vector<16x32xf32>
    %cst_100 = arith.constant 2.000000e+00 : f32
    %303 = vector.broadcast %cst_100 : f32 to vector<16x32xf32>
    %304 = arith.mulf %303, %302 : vector<16x32xf32>
    %305 = arith.addf %301, %304 : vector<16x32xf32>
    %c0_101 = arith.constant 0 : index
    %c0_102 = arith.constant 0 : index
    %306 = vector.load %arg12[%c0_101, %c0_102] : memref<16x32xf32, #tpu.memory_space<vmem>>, vector<16x32xf32>
    tpu.vector_store %arg12[%c0_101, %c0_102], %305 {strides = array<i32>} : memref<16x32xf32, #tpu.memory_space<vmem>>, vector<16x32xf32>,
    return
  }
  func.func @transform_0(%arg0: i32) -> (i32, i32) {
    %c0_i32 = arith.constant 0 : i32
    %c0_i32_0 = arith.constant 0 : i32
    return %arg0, %c0_i32 : i32, i32
  }
  func.func @transform_1(%arg0: i32) -> (i32, i32) {
    %c0_i32 = arith.constant 0 : i32
    %c0_i32_0 = arith.constant 0 : i32
    return %arg0, %c0_i32 : i32, i32
  }
  func.func @transform_2(%arg0: i32) -> (i32, i32) {
    %c0_i32 = arith.constant 0 : i32
    %c0_i32_0 = arith.constant 0 : i32
    return %arg0, %c0_i32 : i32, i32
  }
  func.func @transform_3(%arg0: i32) -> (i32, i32) {
    %c0_i32 = arith.constant 0 : i32
    %c0_i32_0 = arith.constant 0 : i32
    return %arg0, %c0_i32 : i32, i32
  }
  func.func @transform_4(%arg0: i32) -> (i32, i32) {
    %c0_i32 = arith.constant 0 : i32
    %c0_i32_0 = arith.constant 0 : i32
    return %arg0, %c0_i32 : i32, i32
  }
  func.func @transform_5(%arg0: i32) -> (i32, i32) {
    %c0_i32 = arith.constant 0 : i32
    %c0_i32_0 = arith.constant 0 : i32
    %c0_i32_1 = arith.constant 0 : i32
    return %c0_i32, %c0_i32_0 : i32, i32
  }
  func.func @transform_6(%arg0: i32) -> (i32, i32) {
    %c0_i32 = arith.constant 0 : i32
    %c0_i32_0 = arith.constant 0 : i32
    %c0_i32_1 = arith.constant 0 : i32
    return %c0_i32, %c0_i32_0 : i32, i32
  }
  func.func @transform_7(%arg0: i32) -> (i32, i32) {
    %c0_i32 = arith.constant 0 : i32
    %c0_i32_0 = arith.constant 0 : i32
    %c0_i32_1 = arith.constant 0 : i32
    return %c0_i32, %c0_i32_0 : i32, i32
  }
  func.func @transform_8(%arg0: i32) -> (i32, i32) {
    %c0_i32 = arith.constant 0 : i32
    %c0_i32_0 = arith.constant 0 : i32
    %c0_i32_1 = arith.constant 0 : i32
    return %c0_i32, %c0_i32_0 : i32, i32
  }
  func.func @transform_9(%arg0: i32) -> (i32, i32) {
    %c0_i32 = arith.constant 0 : i32
    %c0_i32_0 = arith.constant 0 : i32
    %c0_i32_1 = arith.constant 0 : i32
    return %c0_i32, %c0_i32_0 : i32, i32
  }
  func.func @transform_10(%arg0: i32) -> (i32, i32) {
    %c0_i32 = arith.constant 0 : i32
    %c0_i32_0 = arith.constant 0 : i32
    %c0_i32_1 = arith.constant 0 : i32
    return %c0_i32, %c0_i32_0 : i32, i32
  }
  func.func @transform_11(%arg0: i32) -> (i32, i32) {
    %c0_i32 = arith.constant 0 : i32
    %c0_i32_0 = arith.constant 0 : i32
    return %arg0, %c0_i32 : i32, i32
  }
}

</mosaic_0001>

<bundles_post_ra>
// kernel: tpu_custom_call.1
= control target key start
LH: loop header
LB: loop body
LE: loop exit
PB: predicated region body
PF: predicated region fallthrough
CT: control target
= control target key end

     0   :  { %16 = vsyncpa [#allocation4], 0  ;;  %s3867_s0 = inlined_call_operand.hbm [shape: bf16[16,32], index: 0, kind: input, shape index: {}]   ;;  %s3868_s1 = inlined_call_operand.hbm [shape: bf16[16,32], index: 1, kind: input, shape index: {}]   ;;  %s3869_s2 = inlined_call_operand.hbm [shape: bf16[16,32], index: 2, kind: input, shape index: {}]   ;;  %s3870_s3 = inlined_call_operand.hbm [shape: bf16[16,32], index: 3, kind: input, shape index: {}]   ;;  %s3871_s4 = inlined_call_operand.vmem [shape: f32[16,32], index: 4, kind: input, shape index: {}]   ;;  %s3872_s5 = inlined_call_operand.vmem [shape: bf16[32,32], index: 5, kind: input, shape index: {}]   ;;  %s3873_s6 = inlined_call_operand.vmem [shape: bf16[32,32], index: 6, kind: input, shape index: {}]   ;;  %s3874_s7 = inlined_call_operand.hbm [shape: bf16[32,32], index: 7, kind: input, shape index: {}]   ;;  %s3875_s8 = inlined_call_operand.vmem [shape: bf16[64,32], index: 8, kind: input, shape index: {}]   ;;  %s3876_s9 = inlined_call_operand.vmem [shape: f32[1,32], index: 9, kind: input, shape index: {}]   ;;  %s3877_s10 = inlined_call_operand.vmem [shape: f32[1,32], index: 10, kind: input, shape index: {}]   ;;  %s3878_s11 = inlined_call_operand.hbm [shape: f32[16,32], index: 11, kind: output, shape index: {}]  }
   0x1   :  { %17 = vsyncpa [#allocation7], 0 }
   0x2   :  { %18 = vsyncpa [#allocation10], 0 }
   0x3   :  { %19 = vsyncpa [#allocation5], 0  ;;  %s3213_s17 = smov [#allocation6]   ;;  %s3214_s19 = smov [#allocation9]  }
   0x4   :  { %s37_s18 = sshll.u32 %s3213_s17, 4  ;;  %s61_s20 = sshll.u32 %s3214_s19, 4  ;;  %s38_s18 = int_to_ptr.vmem [resolvable:$true] %s37_s18  ;;  %s62_s20 = int_to_ptr.vmem [resolvable:$true] %s61_s20 }
   0x5   :  { %s3093_s21 = scalar_lea.vmem %s38_s18, 128  ;;  %p3098_p1 = scmp.lt.s32.totalorder %s38_s18, %s38_s18 }
   0x6   :  { %p3094_p0 = scmp.ne.s32.totalorder %s38_s18, %s3093_s21  ;;  %p3099_p2 = scmp.lt.s32.totalorder %s3093_s21, %s3093_s21 }
   0x8   :  { %p3100_p3 = por %p3099_p2, %p3098_p1 }
   0xa   :  { %p3101_p4 = pnand %p3100_p3, %p3094_p0 }
   0xc   :  { %3104 = shalt.err (!%p3101_p4)
}
   0xd   :  { %s3215_s22 = smov 64   ;;  %s3216_s23 = smov 4  }
   0xe   :  { %43 = dma.hbm_to_vmem [thread:$0]  %s3868_s1, 128, %s38_s18, [#allocation7], %s3215_s22, %s3215_s22, %s3216_s23  }
   0xf   :  { %s3113_s26 = scalar_lea.vmem %s62_s20, 128  ;;  %p3118_p6 = scmp.lt.s32.totalorder %s62_s20, %s62_s20 }
  0x10   :  { %p3114_p5 = scmp.ne.s32.totalorder %s62_s20, %s3113_s26  ;;  %p3119_p7 = scmp.lt.s32.totalorder %s3113_s26, %s3113_s26 }
  0x12   :  { %p3120_p8 = por %p3119_p7, %p3118_p6 }
  0x14   :  { %p3121_p9 = pnand %p3120_p8, %p3114_p5 }
  0x16   :  { %3124 = shalt.err (!%p3121_p9)
}
  0x17   :  { %67 = dma.hbm_to_vmem [thread:$0]  %s3870_s3, 128, %s62_s20, [#allocation10], %s3215_s22, %s3215_s22, %s3216_s23  }
  0x18   :  { %s3217_s29 = smov [#allocation3]   ;;  %s3218_s12 = smov [#allocation8]  }
  0x19   :  { %s25_s30 = sshll.u32 %s3217_s29, 4  ;;  %s49_s13 = sshll.u32 %s3218_s12, 4  ;;  %s26_s30 = int_to_ptr.vmem [resolvable:$true] %s25_s30  ;;  %s50_s13 = int_to_ptr.vmem [resolvable:$true] %s49_s13 }
  0x1a   :  { %s3133_s1 = scalar_lea.vmem %s26_s30, 128  ;;  %p3138_p11 = scmp.lt.s32.totalorder %s26_s30, %s26_s30 }
  0x1b   :  { %p3134_p10 = scmp.ne.s32.totalorder %s26_s30, %s3133_s1  ;;  %p3139_p12 = scmp.lt.s32.totalorder %s3133_s1, %s3133_s1 }
  0x1d   :  { %p3140_p13 = por %p3139_p12, %p3138_p11 }
  0x1f   :  { %p3141_p0 = pnand %p3140_p13, %p3134_p10 }
  0x21   :  { %3144 = shalt.err (!%p3141_p0)
}
  0x22   :  { %31 = dma.hbm_to_vmem [thread:$0]  %s3867_s0, 128, %s26_s30, [#allocation4], %s3215_s22, %s3215_s22, %s3216_s23  }
  0x23   :  { %s3153_s3 = scalar_lea.vmem %s50_s13, 128  ;;  %p3158_p2 = scmp.lt.s32.totalorder %s50_s13, %s50_s13 }
  0x24   :  { %p3154_p1 = scmp.ne.s32.totalorder %s50_s13, %s3153_s3  ;;  %p3159_p3 = scmp.lt.s32.totalorder %s3153_s3, %s3153_s3 }
  0x26   :  { %p3160_p4 = por %p3159_p3, %p3158_p2 }
  0x28   :  { %p3161_p5 = pnand %p3160_p4, %p3154_p1 }
  0x2a   :  { %3164 = shalt.err (!%p3161_p5)
}
  0x2b   :  { %55 = dma.hbm_to_vmem [thread:$0]  %s3869_s2, 128, %s50_s13, [#allocation7], %s3215_s22, %s3215_s22, %s3216_s23  }
  0x2c   :  { %s3219_s18 = smov [#allocation11]  }
  0x2d   :  { %s79_s19 = sshll.u32 %s3219_s18, 4  ;;  %s80_s19 = int_to_ptr.vmem [resolvable:$true] %s79_s19 }
  0x2e   :  { %s3173_s20 = scalar_lea.vmem %s80_s19, 256  ;;  %p3178_p7 = scmp.lt.s32.totalorder %s80_s19, %s80_s19 }
  0x2f   :  { %p3174_p6 = scmp.ne.s32.totalorder %s80_s19, %s3173_s20  ;;  %p3179_p8 = scmp.lt.s32.totalorder %s3173_s20, %s3173_s20 }
  0x31   :  { %p3180_p9 = por %p3179_p8, %p3178_p7 }
  0x33   :  { %p3181_p10 = pnand %p3180_p9, %p3174_p6 }
  0x35   :  { %3184 = shalt.err (!%p3181_p10)
}
  0x36   :  { %85 = dma.hbm_to_vmem [thread:$0]  %s3874_s7, 256, %s80_s19, [#allocation10], %s3215_s22, %s3215_s22, %s3216_s23  }
  0x37   :  { %3205 = dma.done.wait [#allocation4], 128  }
  0x38   :  { %3206 = vsyncadd [#allocation4], 4294967168 }
  0x39   :  { %3207 = dma.done.wait [#allocation7], 256  }
  0x3a   :  { %3208 = vsyncadd [#allocation7], 4294967040 }
  0x3b   :  { %3209 = dma.done.wait [#allocation10], 384  }
  0x3c   :  { %3210 = vsyncadd [#allocation10], 4294966912  ;;  %v2626_v0 = vld [vmem:[#allocation3] sm:$0xff]   ;;  %vm114_vm0 = vcmask 261120   ;;  %v2634_v1 = vld [vmem:[#allocation8] sm:$0xff]   ;;  %v3220_v45 = vmov 0.0  }
  0x3d   :  { %v2627_v2 = vunpack.c.l.bf16 %v2626_v0  ;;  %v2635_v3 = vunpack.c.l.bf16 %v2634_v1  ;;  %v2628_v4 = vunpack.c.h.bf16 %v2626_v0  ;;  %v2636_v5 = vunpack.c.h.bf16 %v2634_v1  ;;  %v3336_v22 = vld [vmem:[#allocation6] sm:$0xff]   ;;  %v3349_v30 = vld [vmem:[#allocation9] sm:$0xff]   ;;  %v3367_v42 = vld [vmem:[%s3871_s4 + $0x8] sm:$0xff]  ;;  %2725 = vmatprep.subr.bf16.mxu0 %v3220_v45  ;;  %2733 = vmatprep.subr.bf16.mxu1 %v3220_v45  ;;  %s3223_s1 = smov 112   ;;  %s3224_s14 = smov 104  }
  0x3e   :  { %v2631_v28 = vunpack.c.l.bf16 %v3336_v22  ;;  %v2639_v34 = vunpack.c.l.bf16 %v3349_v30  ;;  %v2632_v35 = vunpack.c.h.bf16 %v3336_v22  ;;  %v2640_v38 = vunpack.c.h.bf16 %v3349_v30  ;;  %v476_v39 = vld [vmem:[%s3871_s4] sm:$0xff]  ;;  %v2990_v44 = vld [vmem:[%s3872_s5 + $0x8] sm:$0xff]   ;;  %s3225_s15 = smov 32   ;;  %s3226_s3 = smov 8  }
  0x3f   :  { %v115_v6 = vsel %vm114_vm0, %v2627_v2, 0.0  ;;  %v304_v7 = vsel %vm114_vm0, %v2635_v3, 0.0  ;;  %v118_v8 = vsel %vm114_vm0, %v2628_v4, 0.0  ;;  %v307_v9 = vsel %vm114_vm0, %v2636_v5, 0.0  ;;  %2726 = vmatpush3.bf16.msra.mxu0 %v2990_v44  ;;  %2734 = vmatpush3.bf16.msra.mxu1 %v2990_v44  ;;  %v2991_v46 = vld [vmem:[%s3872_s5] sm:$0xff]   ;;  %s3227_s16 = smov 40  }
  0x40   :  { %116 = vadd.xlane.f32.xlu0 %v115_v6  ;;  %305 = vadd.xlane.f32.xlu1 %v304_v7  ;;  %v224_v32 = vsel %vm114_vm0, %v2631_v28, 0.0  ;;  %v400_v36 = vsel %vm114_vm0, %v2639_v34, 0.0  ;;  %v227_v37 = vsel %vm114_vm0, %v2632_v35, 0.0  ;;  %v478_v40 = vsel %vm114_vm0, %v476_v39, 0.0  ;;  %s3228_s17 = smov 16   ;;  %s3229_s18 = smov 48  }
  0x41   :  { %v403_v41 = vsel %vm114_vm0, %v2640_v38, 0.0  ;;  %v481_v43 = vsel %vm114_vm0, %v3367_v42, 0.0  ;;  %2727 = vmatprep.subr.bf16.mxu0 %v3220_v45  ;;  %2735 = vmatprep.subr.bf16.mxu1 %v3220_v45  ;;  %vm3221_vm1 = vmmov 0   ;;  %vm585_vm2 = vcmask 64512   ;;  %s3230_s19 = smov 24   ;;  %s3231_s25 = smov 56  }
  0x42   :  { %2729 = vmatprep.mubr.msk.bf16.mxu0 %vm3221_vm1, %v3220_v45  ;;  %2737 = vmatprep.mubr.msk.bf16.mxu1 %vm3221_vm1, %v3220_v45  ;;  %vm705_vm3 = vcmask 1043456   ;;  %vm803_vm4 = vcmask 60416   ;;  %vm1030_vm5 = vcmask 322816   ;;  %vm1265_vm6 = vcmask 126016   ;;  %s3232_s28 = smov [#allocation12]  }
  0x43   :  { %2728 = vmatpush3.bf16.msra.mxu0 %v2991_v46  ;;  %2736 = vmatpush3.bf16.msra.mxu1 %v2991_v46  ;;  %vm1490_vm7 = vcmask 388416   ;;  %vm1725_vm8 = vcmask 191616   ;;  %vm1950_vm9 = vcmask 454016   ;;  %vm2185_vm10 = vcmask 257216  }
  0x44   :  { %119 = vadd.xlane.f32.xlu0 %v118_v8  ;;  %308 = vadd.xlane.f32.xlu1 %v307_v9  ;;  %vm2410_vm11 = vcmask 519616   ;;  %vm2456_vm12 = vcmask 523264  }
  0x45   :  { %2741 = vmatprep.subr.bf16.mxu0 %v3220_v45  ;;  %2749 = vmatprep.subr.bf16.mxu1 %v3220_v45 }
  0xc9   :  { %v117_v10 = vpop.xlane.xlu0 %116  ;;  %v306_v11 = vpop.xlane.xlu1 %305 }
  0xca   :  { %v122_v12 = vmul.f32 0.03125, %v117_v10  ;;  %v310_v13 = vmul.f32 0.03125, %v306_v11 }
  0xcc   :  { %v3328_v14 = vsub.f32 %v2627_v2, %v122_v12  ;;  %v3330_v15 = vsub.f32 %v2635_v3, %v310_v13 }
  0xcd   :  { %v120_v16 = vpop.xlane.xlu0 %119  ;;  %v309_v17 = vpop.xlane.xlu1 %308 }
  0xce   :  { %v123_v18 = vmul.f32 0.03125, %v120_v16  ;;  %v311_v19 = vmul.f32 0.03125, %v309_v17  ;;  %v126_v20 = vmul.f32 %v3328_v14, %v3328_v14  ;;  %v314_v21 = vmul.f32 %v3330_v15, %v3330_v15 }
  0xd0   :  { %v3338_v23 = vsub.f32 %v2628_v4, %v123_v18  ;;  %v3340_v24 = vsub.f32 %v2636_v5, %v311_v19  ;;  %v128_v25 = vsel %vm114_vm0, %v126_v20, 0.0  ;;  %v316_v26 = vsel %vm114_vm0, %v314_v21, 0.0  ;;  %v3409_v19 = vld [vmem:[%s3876_s9] ss:$0 sm:$0xff]  ;;  %s2508_s9 = sshll.u32 %s3232_s28, 4  ;;  %s2509_s9 = int_to_ptr.vmem [resolvable:$true] %s2508_s9 }
  0xd1   :  { %129 = vadd.xlane.f32.xlu0 %v128_v25  ;;  %s3185_s29 = scalar_lea.vmem %s2509_s9, 256  ;;  %p3190_p12 = scmp.lt.s32.totalorder %s2509_s9, %s2509_s9 }
  0xd2   :  { %v127_v27 = vmul.f32 %v3338_v23, %v3338_v23  ;;  %v315_v29 = vmul.f32 %v3340_v24, %v3340_v24  ;;  %p3186_p11 = scmp.ne.s32.totalorder %s2509_s9, %s3185_s29  ;;  %p3191_p13 = scmp.lt.s32.totalorder %s3185_s29, %s3185_s29 }
  0xd4   :  { %v131_v31 = vsel %vm114_vm0, %v127_v27, 0.0  ;;  %v319_v33 = vsel %vm114_vm0, %v315_v29, 0.0  ;;  %p3192_p0 = por %p3191_p13, %p3190_p12 }
  0xd5   :  { %317 = vadd.xlane.f32.xlu0 %v316_v26  ;;  %132 = vadd.xlane.f32.xlu1 %v131_v31 }
  0xd6   :  { %p3193_p1 = pnand %p3192_p0, %p3186_p11 }
  0xd9   :  { %225 = vadd.xlane.f32.xlu0 %v224_v32  ;;  %320 = vadd.xlane.f32.xlu1 %v319_v33  ;;  %v3426_v33 = vld [vmem:[%s3877_s10] ss:$0 sm:$0xff] }
  0xdd   :  { %401 = vadd.xlane.f32.xlu0 %v400_v36  ;;  %228 = vadd.xlane.f32.xlu1 %v227_v37 }
  0xe1   :  { %479 = vadd.xlane.f32.xlu0 %v478_v40  ;;  %404 = vadd.xlane.f32.xlu1 %v403_v41  ;;  %v3439_v41 = vld [vmem:[%s3873_s6 + $0x8] sm:$0xff]  }
  0xe5   :  { %482 = vadd.xlane.f32.xlu1 %v481_v43 }
 0x15a   :  { %v130_v47 = vpop.xlane.xlu0 %129 }
 0x15b   :  { %v134_v48 = vmul.f32 0.03125, %v130_v47 }
 0x15d   :  { %v136_v49 = vadd.f32 1e-06, %v134_v48  ;;  %v2994_v48 = vld [vmem:[#allocation11 + $0x8] sm:$0xff]  }
 0x15e   :  { %v133_v50 = vpop.xlane.xlu1 %132  ;;  %v318_v51 = vpop.xlane.xlu0 %317 }
 0x15f   :  { %3001 = vrsqrt.f32 %v136_v49  ;;  %v135_v52 = vmul.f32 0.03125, %v133_v50  ;;  %v322_v53 = vmul.f32 0.03125, %v318_v51  ;;  %v2995_v49 = vld [vmem:[#allocation11] sm:$0xff]  }
 0x161   :  { %v137_v54 = vadd.f32 1e-06, %v135_v52  ;;  %v324_v55 = vadd.f32 1e-06, %v322_v53 }
 0x162   :  { %v321_v56 = vpop.xlane.xlu1 %320  ;;  %v226_v57 = vpop.xlane.xlu0 %225 }
 0x163   :  { %3003 = vrsqrt.f32 %v137_v54  ;;  %v323_v58 = vmul.f32 0.03125, %v321_v56  ;;  %v230_v59 = vmul.f32 0.03125, %v226_v57 }
 0x164   :  { %3005 = vrsqrt.f32 %v324_v55 }
 0x165   :  { %v325_v60 = vadd.f32 1e-06, %v323_v58  ;;  %v3387_v61 = vsub.f32 %v2631_v28, %v230_v59 }
 0x166   :  { %v229_v62 = vpop.xlane.xlu1 %228  ;;  %v402_v63 = vpop.xlane.xlu0 %401 }
 0x167   :  { %3007 = vrsqrt.f32 %v325_v60  ;;  %v231_v0 = vmul.f32 0.03125, %v229_v62  ;;  %v406_v1 = vmul.f32 0.03125, %v402_v63  ;;  %v234_v2 = vmul.f32 %v3387_v61, %v3387_v61 }
 0x169   :  { %v3391_v3 = vsub.f32 %v2632_v35, %v231_v0  ;;  %v3393_v4 = vsub.f32 %v2639_v34, %v406_v1  ;;  %v236_v5 = vsel %vm114_vm0, %v234_v2, 0.0 }
 0x16a   :  { %v405_v6 = vpop.xlane.xlu1 %404  ;;  %237 = vadd.xlane.f32.xlu0 %v236_v5  ;;  %v480_v7 = vpop.xlane.xlu0 %479 }
 0x16b   :  { %v407_v8 = vmul.f32 0.03125, %v405_v6  ;;  %v484_v9 = vmul.f32 0.03125, %v480_v7  ;;  %v235_v10 = vmul.f32 %v3391_v3, %v3391_v3  ;;  %v410_v11 = vmul.f32 %v3393_v4, %v3393_v4 }
 0x16c   :  { %v3002_v12 = vpop.eup %3001 }
 0x16d   :  { %v3400_v13 = vsub.f32 %v2640_v38, %v407_v8  ;;  %v3402_v16 = vsub.f32 %v476_v39, %v484_v9  ;;  %v239_v17 = vsel %vm114_vm0, %v235_v10, 0.0  ;;  %v412_v18 = vsel %vm114_vm0, %v410_v11, 0.0 }
 0x16e   :  { %240 = vadd.xlane.f32.xlu1 %v239_v17  ;;  %v483_v20 = vpop.xlane.xlu1 %482  ;;  %413 = vadd.xlane.f32.xlu0 %v412_v18  ;;  %v140_v21 = vmul.f32 %v3002_v12, %v3328_v14 }
 0x16f   :  { %v485_v22 = vmul.f32 0.03125, %v483_v20  ;;  %v411_v25 = vmul.f32 %v3400_v13, %v3400_v13  ;;  %v488_v26 = vmul.f32 %v3402_v16, %v3402_v16 }
 0x170   :  { %v3004_v27 = vpop.eup %3003  ;;  %v148_v28 = vmul.f32 %v3409_v19, %v140_v21 }
 0x171   :  { %v3006_v29 = vpop.eup %3005  ;;  %v3418_v30 = vsub.f32 %v3367_v42, %v485_v22  ;;  %v415_v31 = vsel %vm114_vm0, %v411_v25, 0.0  ;;  %v490_v32 = vsel %vm114_vm0, %v488_v26, 0.0  ;;  %v141_v14 = vmul.f32 %v3004_v27, %v3338_v23 }
 0x172   :  { %416 = vadd.xlane.f32.xlu1 %v415_v31  ;;  %491 = vadd.xlane.f32.xlu0 %v490_v32  ;;  %v328_v37 = vmul.f32 %v3006_v29, %v3330_v15  ;;  %v156_v23 = vadd.f32 %v3426_v33, %v148_v28 }
 0x173   :  { %v489_v34 = vmul.f32 %v3418_v30, %v3418_v30  ;;  %v149_v35 = vmul.f32 %v3409_v19, %v141_v14 }
 0x174   :  { %v3008_v36 = vpop.eup %3007  ;;  %v330_v15 = vmul.f32 %v3409_v19, %v328_v37 }
 0x175   :  { %v329_v38 = vmul.f32 %v3008_v36, %v3340_v24  ;;  %v493_v39 = vsel %vm114_vm0, %v489_v34, 0.0  ;;  %v157_v40 = vadd.f32 %v3426_v33, %v149_v35  ;;  %v3448_v24 = vld [vmem:[%s3873_s6] sm:$0xff]   ;;  %s3222_s6 = smov 120  }
 0x176   :  { %494 = vadd.xlane.f32.xlu1 %v493_v39  ;;  %v332_v46 = vadd.f32 %v3426_v33, %v330_v15 }
 0x177   :  { %v158_v42 = vpack.c.bf16 %v157_v40, %v156_v23  ;;  %v331_v43 = vmul.f32 %v3409_v19, %v329_v38 }
 0x179   :  { %2730 = vmatmul.mubr.msk.bf16.vlgmr.msra.gmra.mxu0 %vm114_vm0, %v158_v42  ;;  %v333_v44 = vadd.f32 %v3426_v33, %v331_v43 }
 0x17a   :  { %2742 = vmatpush3.bf16.msra.mxu0 %v3439_v41  ;;  %2745 = vmatprep.mubr.msk.bf16.mxu0 %vm3221_vm1, %v3220_v45 }
 0x17b   :  { %2743 = vmatprep.subr.bf16.mxu0 %v3220_v45  ;;  %v334_v47 = vpack.c.bf16 %v333_v44, %v332_v46 }
 0x17e   :  { %2744 = vmatpush3.bf16.msra.mxu0 %v3448_v24 }
 0x17f   :  { %2757 = vmatprep.subr.bf16.mxu0 %v3220_v45 }
 0x181   :  { %2746 = vmatmul.mubr.msk.bf16.vlgmr.msra.gmra.mxu0 %vm114_vm0, %v334_v47 }
 0x182   :  { %2761 = vmatprep.mubr.msk.bf16.mxu0 %vm3221_vm1, %v3220_v45  ;;  %2758 = vmatpush3.bf16.msra.mxu0 %v2994_v48 }
 0x183   :  { %2759 = vmatprep.subr.bf16.mxu0 %v3220_v45 }
 0x186   :  { %2760 = vmatpush3.bf16.msra.mxu0 %v2995_v49 }
 0x187   :  { %2771 = vmatprep.subr.bf16.mxu0 %v3220_v45 }
 0x1f3   :  { %v238_v50 = vpop.xlane.xlu0 %237 }
 0x1f4   :  { %v242_v51 = vmul.f32 0.03125, %v238_v50 }
 0x1f6   :  { %v244_v52 = vadd.f32 1e-06, %v242_v51 }
 0x1f7   :  { %v241_v53 = vpop.xlane.xlu1 %240  ;;  %v414_v54 = vpop.xlane.xlu0 %413 }
 0x1f8   :  { %3009 = vrsqrt.f32 %v244_v52  ;;  %v243_v55 = vmul.f32 0.03125, %v241_v53  ;;  %v418_v56 = vmul.f32 0.03125, %v414_v54 }
 0x1fa   :  { %v245_v57 = vadd.f32 1e-06, %v243_v55  ;;  %v420_v58 = vadd.f32 1e-06, %v418_v56 }
 0x1fb   :  { %v417_v59 = vpop.xlane.xlu1 %416  ;;  %v492_v60 = vpop.xlane.xlu0 %491 }
 0x1fc   :  { %3011 = vrsqrt.f32 %v245_v57  ;;  %v419_v62 = vmul.f32 0.03125, %v417_v59  ;;  %v496_v63 = vmul.f32 0.03125, %v492_v60 }
 0x1fd   :  { %3013 = vrsqrt.f32 %v420_v58 }
 0x1fe   :  { %v421_v0 = vadd.f32 1e-06, %v419_v62  ;;  %v498_v1 = vadd.f32 1e-06, %v496_v63 }
 0x1ff   :  { %v495_v2 = vpop.xlane.xlu1 %494 }
 0x200   :  { %3015 = vrsqrt.f32 %v421_v0  ;;  %v497_v5 = vmul.f32 0.03125, %v495_v2 }
 0x201   :  { %3017 = vrsqrt.f32 %v498_v1 }
 0x202   :  { %v499_v6 = vadd.f32 1e-06, %v497_v5 }
 0x204   :  { %3019 = vrsqrt.f32 %v499_v6 }
 0x205   :  { %v3010_v7 = vpop.eup %3009 }
 0x206   :  { %v248_v8 = vmul.f32 %v3010_v7, %v3387_v61 }
 0x208   :  { %v250_v11 = vmul.f32 %v3409_v19, %v248_v8 }
 0x209   :  { %v3012_v9 = vpop.eup %3011 }
 0x20a   :  { %v249_v10 = vmul.f32 %v3012_v9, %v3391_v3  ;;  %v3014_v12 = vpop.eup %3013  ;;  %v252_v25 = vadd.f32 %v3426_v33, %v250_v11 }
 0x20b   :  { %v424_v21 = vmul.f32 %v3014_v12, %v3393_v4 }
 0x20c   :  { %v251_v17 = vmul.f32 %v3409_v19, %v249_v10 }
 0x20d   :  { %v3016_v18 = vpop.eup %3015  ;;  %v426_v31 = vmul.f32 %v3409_v19, %v424_v21 }
 0x20e   :  { %v3018_v20 = vpop.eup %3017  ;;  %v425_v22 = vmul.f32 %v3016_v18, %v3400_v13  ;;  %v253_v26 = vadd.f32 %v3426_v33, %v251_v17 }
 0x20f   :  { %v502_v61 = vmul.f32 %v3018_v20, %v3402_v16  ;;  %v428_v32 = vadd.f32 %v3426_v33, %v426_v31 }
 0x210   :  { %v254_v27 = vpack.c.bf16 %v253_v26, %v252_v25  ;;  %v427_v3 = vmul.f32 %v3409_v19, %v425_v22 }
 0x211   :  { %v3020_v28 = vpop.eup %3019  ;;  %v504_v4 = vmul.f32 %v3409_v19, %v502_v61 }
 0x212   :  { %v503_v29 = vmul.f32 %v3020_v28, %v3418_v30  ;;  %2738 = vmatmul.mubr.msk.bf16.vlgmr.msra.gmra.mxu1 %vm114_vm0, %v254_v27  ;;  %v429_v13 = vadd.f32 %v3426_v33, %v427_v3 }
 0x213   :  { %2750 = vmatpush3.bf16.msra.mxu1 %v3439_v41  ;;  %2753 = vmatprep.mubr.msk.bf16.mxu1 %vm3221_vm1, %v3220_v45  ;;  %v506_v30 = vadd.f32 %v3426_v33, %v504_v4 }
 0x214   :  { %2751 = vmatprep.subr.bf16.mxu1 %v3220_v45  ;;  %v505_v16 = vmul.f32 %v3409_v19, %v503_v29  ;;  %v430_v34 = vpack.c.bf16 %v429_v13, %v428_v32 }
 0x216   :  { %v507_v14 = vadd.f32 %v3426_v33, %v505_v16 }
 0x217   :  { %2752 = vmatpush3.bf16.msra.mxu1 %v3448_v24 }
 0x218   :  { %v508_v35 = vpack.c.bf16 %v507_v14, %v506_v30  ;;  %2765 = vmatprep.subr.bf16.mxu1 %v3220_v45 }
 0x21a   :  { %2754 = vmatmul.mubr.msk.bf16.vlgmr.msra.gmra.mxu1 %vm114_vm0, %v430_v34  ;;  %2762 = vmatmul.mubr.msk.bf16.vlgmr.msra.gmra.mxu0 %vm114_vm0, %v508_v35 }
 0x21b   :  { %2767 = vmatprep.mubr.msk.bf16.mxu1 %vm3221_vm1, %v3220_v45  ;;  %2773 = vmatprep.mubr.msk.bf16.mxu0 %vm3221_vm1, %v3220_v45 }
 0x239   :  { %v212_v19 = vpop.f32.mrf.mxu0 }
 0x23a   :  { %v3502_v24 = vpack.c.bf16 %v212_v19, %v212_v19 }
 0x23b   :  { %v2731_v36 = vpop.f32.mrf.mxu0 }
 0x23d   :  { %v215_v37 = vpop.f32.mrf.mxu0 }
 0x23e   :  { %v3509_v44 = vpack.c.bf16 %v215_v37, %v215_v37 }
 0x23f   :  { %v2732_v33 = vpop.f32.mrf.mxu0 }
 0x241   :  { %v388_v38 = vpop.f32.mrf.mxu0 }
 0x242   :  { %v3493_v39 = vpack.c.bf16 %v388_v38, %v388_v38 }
 0x243   :  { %v2747_v23 = vpop.f32.mrf.mxu0 }
 0x244   :  { %v590_v40 = vsel %vm585_vm2, %v3493_v39, 0 }
 0x245   :  { %v391_v41 = vpop.f32.mrf.mxu0  ;;  %2766 = vmatpush3.bf16.xpose.msra.mxu1 %v590_v40 }
 0x246   :  { %v3497_v42 = vpack.c.bf16 %v391_v41, %v391_v41  ;;  %2777 = vmatprep.subr.bf16.mxu1 %v3220_v45 }
 0x247   :  { %v2748_v43 = vpop.f32.mrf.mxu0 }
 0x248   :  { %v636_v15 = vsel %vm585_vm2, %v3497_v42, 0 }
 0x249   :  { %2772 = vmatpush3.bf16.xpose.msra.mxu0 %v636_v15 }
 0x24a   :  { %2783 = vmatprep.subr.bf16.mxu0 %v3220_v45 }
 0x24c   :  { %2768 = vmatmul.mubr.msk.bf16.vlgmr.msra.gmra.mxu1 %vm585_vm2, %v3502_v24 }
 0x24d   :  { %2779 = vmatprep.mubr.msk.bf16.mxu1 %vm3221_vm1, %v3220_v45 }
 0x250   :  { %2774 = vmatmul.mubr.msk.bf16.vlgmr.msra.gmra.mxu0 %vm585_vm2, %v3509_v44 }
 0x251   :  { %2785 = vmatprep.mubr.msk.bf16.mxu0 %vm3221_vm1, %v3220_v45 }
 0x2d2   :  { %v3515_v46 = vpop.f32.mrf.mxu1 }
 0x2d3   :  { %v3550_v35 = vpack.c.bf16 %v3515_v46, %v3515_v46 }
 0x2d4   :  { %v2739_v47 = vpop.f32.mrf.mxu1 }
 0x2d6   :  { %v3517_v48 = vpop.f32.mrf.mxu1 }
 0x2d7   :  { %v3559_v19 = vpack.c.bf16 %v3517_v48, %v3517_v48 }
 0x2d8   :  { %v2740_v49 = vpop.f32.mrf.mxu1 }
 0x2da   :  { %v468_v50 = vpop.f32.mrf.mxu1  ;;  %v562_v51 = vpop.f32.mrf.mxu0 }
 0x2db   :  { %v3519_v52 = vpack.c.bf16 %v562_v51, %v562_v51  ;;  %v3533_v29 = vpack.c.bf16 %v468_v50, %v468_v50 }
 0x2dc   :  { %v2755_v53 = vpop.f32.mrf.mxu1  ;;  %v2763_v54 = vpop.f32.mrf.mxu0 }
 0x2dd   :  { %v707_v55 = vsel %vm705_vm3, %v3519_v52, 0  ;;  %v820_v32 = vsel %vm585_vm2, %v3533_v29, 0 }
 0x2de   :  { %v471_v56 = vpop.f32.mrf.mxu1  ;;  %v565_v57 = vpop.f32.mrf.mxu0  ;;  %2778 = vmatpush3.bf16.msra.mxu1 %v707_v55 }
 0x2df   :  { %v3523_v58 = vpack.c.bf16 %v565_v57, %v565_v57  ;;  %2789 = vmatprep.subr.bf16.mxu1 %v3220_v45  ;;  %v3535_v16 = vpack.c.bf16 %v471_v56, %v471_v56 }
 0x2e0   :  { %v2756_v59 = vpop.f32.mrf.mxu1  ;;  %v2764_v60 = vpop.f32.mrf.mxu0 }
 0x2e1   :  { %v753_v62 = vsel %vm705_vm3, %v3523_v58, 0  ;;  %v866_v34 = vsel %vm585_vm2, %v3535_v16, 0 }
 0x2e2   :  { %2784 = vmatpush3.bf16.msra.mxu0 %v753_v62 }
 0x2e3   :  { %2795 = vmatprep.subr.bf16.mxu0 %v3220_v45 }
 0x30c   :  { %v626_v63 = vpop.f32.mrf.mxu1 }
 0x30d   :  { %v678_v0 = vsel %vm585_vm2, %v626_v63, -inf }
 0x30e   :  { %679 = vmax.xlane.f32.xlu0 %v678_v0  ;;  %v2769_v1 = vpop.f32.mrf.mxu1 }
 0x310   :  { %v629_v2 = vpop.f32.mrf.mxu1  ;;  %v672_v5 = vpop.f32.mrf.mxu0 }
 0x311   :  { %v681_v6 = vsel %vm585_vm2, %v672_v5, -inf }
 0x312   :  { %v2770_v7 = vpop.f32.mrf.mxu1  ;;  %682 = vmax.xlane.f32.xlu1 %v681_v6  ;;  %v2775_v8 = vpop.f32.mrf.mxu0 }
 0x314   :  { %v675_v9 = vpop.f32.mrf.mxu0 }
 0x316   :  { %v2776_v10 = vpop.f32.mrf.mxu0 }
 0x397   :  { %v680_v11 = vpop.xlane.xlu0 %679 }
 0x398   :  { %v684_v12 = vsub.f32 %v626_v63, %v680_v11 }
 0x39a   :  { %v686_v17 = vmul.f32 1.442695, %v684_v12 }
 0x39b   :  { %v683_v18 = vpop.xlane.xlu1 %682 }
 0x39c   :  { %3021 = vpow2.f32 %v686_v17  ;;  %v685_v20 = vsub.f32 %v672_v5, %v683_v18 }
 0x39e   :  { %v688_v21 = vmul.f32 1.442695, %v685_v20 }
 0x3a0   :  { %3023 = vpow2.f32 %v688_v21 }
 0x3a9   :  { %v3022_v22 = vpop.eup %3021 }
 0x3aa   :  { %v690_v25 = vsel %vm585_vm2, %v3022_v22, 0.0 }
 0x3ab   :  { %691 = vadd.xlane.f32.xlu0 %v690_v25 }
 0x3ad   :  { %v3024_v26 = vpop.eup %3023 }
 0x3ae   :  { %v693_v61 = vsel %vm585_vm2, %v3024_v26, 0.0 }
 0x3af   :  { %694 = vadd.xlane.f32.xlu1 %v693_v61 }
 0x434   :  { %v692_v27 = vpop.xlane.xlu0 %691 }
 0x435   :  { %3025 = vrcp.f32 %v692_v27 }
 0x438   :  { %v695_v3 = vpop.xlane.xlu1 %694 }
 0x439   :  { %3027 = vrcp.f32 %v695_v3 }
 0x442   :  { %v3026_v28 = vpop.eup %3025 }
 0x443   :  { %v698_v31 = vmul.f32 %v3026_v28, %v3022_v22 }
 0x445   :  { %v700_v4 = vpack.c.bf16 %v698_v31, %v698_v31 }
 0x446   :  { %v3028_v13 = vpop.eup %3027 }
 0x447   :  { %2780 = vmatmul.mubr.msk.bf16.vlgmr.msra.gmra.mxu1 %vm585_vm2, %v700_v4  ;;  %v699_v30 = vmul.f32 %v3028_v13, %v3024_v26 }
 0x448   :  { %2790 = vmatpush3.bf16.xpose.msra.mxu1 %v820_v32  ;;  %2791 = vmatprep.mubr.msk.bf16.mxu1 %vm3221_vm1, %v3220_v45 }
 0x449   :  { %v701_v14 = vpack.c.bf16 %v699_v30, %v699_v30  ;;  %2801 = vmatprep.subr.bf16.mxu1 %v3220_v45 }
 0x44b   :  { %2786 = vmatmul.mubr.msk.bf16.vlgmr.msra.gmra.mxu0 %vm585_vm2, %v701_v14 }
 0x44c   :  { %2796 = vmatpush3.bf16.xpose.msra.mxu0 %v866_v34  ;;  %2797 = vmatprep.mubr.msk.bf16.mxu0 %vm3221_vm1, %v3220_v45 }
 0x44d   :  { %2807 = vmatprep.subr.bf16.mxu0 %v3220_v45 }
 0x44f   :  { %2792 = vmatmul.mubr.msk.bf16.vlgmr.msra.gmra.mxu1 %vm585_vm2, %v3550_v35 }
 0x450   :  { %2802 = vmatpush3.bf16.msra.mxu1 %v707_v55  ;;  %2803 = vmatprep.mubr.msk.bf16.mxu1 %vm3221_vm1, %v3220_v45 }
 0x451   :  { %2813 = vmatprep.subr.bf16.mxu1 %v3220_v45 }
 0x453   :  { %2798 = vmatmul.mubr.msk.bf16.vlgmr.msra.gmra.mxu0 %vm585_vm2, %v3559_v19 }
 0x454   :  { %2808 = vmatpush3.bf16.msra.mxu0 %v753_v62  ;;  %2809 = vmatprep.mubr.msk.bf16.mxu0 %vm3221_vm1, %v3220_v45 }
 0x455   :  { %2819 = vmatprep.subr.bf16.mxu0 %v3220_v45 }
 0x507   :  { %v743_v36 = vpop.f32.mrf.mxu1 }
 0x508   :  { %v2605_v37 = vpack.c.bf16 %v743_v36, %v743_v36 }
 0x509   :  { %v2781_v33 = vpop.f32.mrf.mxu1 }
 0x50a   :  { %804 = vst.msk [vmem:[#allocation2] sm:$0xf] %vm803_vm4, %v2605_v37 }
 0x50b   :  { %v746_v38 = vpop.f32.mrf.mxu1  ;;  %v789_v23 = vpop.f32.mrf.mxu0 }
 0x50c   :  { %v2606_v40 = vpack.c.bf16 %v789_v23, %v789_v23 }
 0x50d   :  { %v2782_v41 = vpop.f32.mrf.mxu1  ;;  %v2787_v43 = vpop.f32.mrf.mxu0 }
 0x50e   :  { %805 = vst.msk [vmem:[#allocation2 + $0x4] sm:$0xf] %vm803_vm4, %v2606_v40 }
 0x50f   :  { %v792_v15 = vpop.f32.mrf.mxu0  ;;  %v856_v46 = vpop.f32.mrf.mxu1 }
 0x510   :  { %v908_v47 = vsel %vm585_vm2, %v856_v46, -inf }
 0x511   :  { %909 = vmax.xlane.f32.xlu0 %v908_v47  ;;  %v2788_v48 = vpop.f32.mrf.mxu0  ;;  %v2793_v49 = vpop.f32.mrf.mxu1 }
 0x513   :  { %v859_v50 = vpop.f32.mrf.mxu1  ;;  %v902_v51 = vpop.f32.mrf.mxu0 }
 0x514   :  { %v911_v53 = vsel %vm585_vm2, %v902_v51, -inf }
 0x515   :  { %v2794_v54 = vpop.f32.mrf.mxu1  ;;  %912 = vmax.xlane.f32.xlu1 %v911_v53  ;;  %v2799_v55 = vpop.f32.mrf.mxu0 }
 0x517   :  { %v905_v56 = vpop.f32.mrf.mxu0 }
 0x519   :  { %v2800_v57 = vpop.f32.mrf.mxu0 }
 0x526   :  { %1085 = vrot.lane.b32.xlu1 %v3497_v42, %s3222_s6 }
 0x59a   :  { %v910_v59 = vpop.xlane.xlu0 %909 }
 0x59b   :  { %v914_v60 = vsub.f32 %v856_v46, %v910_v59 }
 0x59d   :  { %v916_v62 = vmul.f32 1.442695, %v914_v60 }
 0x59e   :  { %v913_v63 = vpop.xlane.xlu1 %912 }
 0x59f   :  { %3029 = vpow2.f32 %v916_v62  ;;  %v915_v0 = vsub.f32 %v902_v51, %v913_v63 }
 0x5a1   :  { %v918_v1 = vmul.f32 1.442695, %v915_v0 }
 0x5a2   :  { %v1086_v8 = vpop.permute.xlu1 %1085 }
 0x5a3   :  { %3031 = vpow2.f32 %v918_v1  ;;  %v1091_v26 = vsel %vm585_vm2, %v1086_v8, 0 }
 0x5ac   :  { %v3030_v2 = vpop.eup %3029 }
 0x5ad   :  { %v920_v5 = vsel %vm585_vm2, %v3030_v2, 0.0 }
 0x5ae   :  { %921 = vadd.xlane.f32.xlu0 %v920_v5 }
 0x5b0   :  { %v3032_v6 = vpop.eup %3031 }
 0x5b1   :  { %v923_v7 = vsel %vm585_vm2, %v3032_v6, 0.0 }
 0x5b2   :  { %924 = vadd.xlane.f32.xlu1 %v923_v7 }
 0x5c3   :  { %1033 = vrot.lane.b32.xlu1 %v3502_v24, %s3222_s6 }
 0x5c4   :  { %1035 = vrot.lane.b32.xlu0 %v3493_v39, %s3222_s6 }
 0x5c7   :  { %1083 = vrot.lane.b32.xlu1 %v3509_v44, %s3222_s6 }
 0x637   :  { %v922_v9 = vpop.xlane.xlu0 %921 }
 0x638   :  { %3033 = vrcp.f32 %v922_v9 }
 0x63b   :  { %v925_v10 = vpop.xlane.xlu1 %924  ;;  %v1036_v17 = vpop.permute.xlu0 %1035 }
 0x63c   :  { %3035 = vrcp.f32 %v925_v10  ;;  %v1041_v21 = vsel %vm585_vm2, %v1036_v17, 0 }
 0x63f   :  { %v1034_v61 = vpop.permute.xlu1 %1033 }
 0x643   :  { %v1084_v27 = vpop.permute.xlu1 %1083 }
 0x645   :  { %v3034_v11 = vpop.eup %3033 }
 0x646   :  { %v928_v12 = vmul.f32 %v3034_v11, %v3030_v2 }
 0x648   :  { %v930_v18 = vpack.c.bf16 %v928_v12, %v928_v12 }
 0x649   :  { %v3036_v20 = vpop.eup %3035 }
 0x64a   :  { %2804 = vmatmul.mubr.msk.bf16.vlgmr.msra.gmra.mxu1 %vm585_vm2, %v930_v18  ;;  %v929_v22 = vmul.f32 %v3036_v20, %v3032_v6 }
 0x64b   :  { %2814 = vmatpush3.bf16.xpose.msra.mxu1 %v1041_v21  ;;  %2815 = vmatprep.mubr.msk.bf16.mxu1 %vm3221_vm1, %v3220_v45 }
 0x64c   :  { %v931_v25 = vpack.c.bf16 %v929_v22, %v929_v22  ;;  %2825 = vmatprep.subr.bf16.mxu1 %v3220_v45 }
 0x64e   :  { %2810 = vmatmul.mubr.msk.bf16.vlgmr.msra.gmra.mxu0 %vm585_vm2, %v931_v25 }
 0x64f   :  { %2820 = vmatpush3.bf16.xpose.msra.mxu0 %v1091_v26  ;;  %2821 = vmatprep.mubr.msk.bf16.mxu0 %vm3221_vm1, %v3220_v45 }
 0x650   :  { %2831 = vmatprep.subr.bf16.mxu0 %v3220_v45 }
 0x652   :  { %2816 = vmatmul.mubr.msk.bf16.vlgmr.msra.gmra.mxu1 %vm585_vm2, %v1034_v61 }
 0x653   :  { %2827 = vmatprep.mubr.msk.bf16.mxu1 %vm3221_vm1, %v3220_v45 }
 0x656   :  { %2822 = vmatmul.mubr.msk.bf16.vlgmr.msra.gmra.mxu0 %vm585_vm2, %v1084_v27 }
 0x657   :  { %2833 = vmatprep.mubr.msk.bf16.mxu0 %vm3221_vm1, %v3220_v45 }
 0x70a   :  { %v3595_v3 = vpop.f32.mrf.mxu1 }
 0x70c   :  { %v2805_v28 = vpop.f32.mrf.mxu1 }
 0x70e   :  { %v972_v31 = vpop.f32.mrf.mxu1  ;;  %v3597_v4 = vpop.f32.mrf.mxu0 }
 0x710   :  { %v2806_v13 = vpop.f32.mrf.mxu1  ;;  %v2811_v32 = vpop.f32.mrf.mxu0 }
 0x712   :  { %v1015_v30 = vpop.f32.mrf.mxu0  ;;  %v1077_v14 = vpop.f32.mrf.mxu1 }
 0x713   :  { %v1133_v34 = vsel %vm585_vm2, %v1077_v14, -inf }
 0x714   :  { %1134 = vmax.xlane.f32.xlu0 %v1133_v34  ;;  %v2812_v36 = vpop.f32.mrf.mxu0  ;;  %v2817_v37 = vpop.f32.mrf.mxu1 }
 0x716   :  { %v1080_v33 = vpop.f32.mrf.mxu1  ;;  %v1127_v38 = vpop.f32.mrf.mxu0 }
 0x717   :  { %v1136_v23 = vsel %vm585_vm2, %v1127_v38, -inf }
 0x718   :  { %v2818_v40 = vpop.f32.mrf.mxu1  ;;  %1137 = vmax.xlane.f32.xlu1 %v1136_v23  ;;  %v2823_v41 = vpop.f32.mrf.mxu0 }
 0x71a   :  { %v1130_v43 = vpop.f32.mrf.mxu0 }
 0x71c   :  { %v2824_v15 = vpop.f32.mrf.mxu0 }
 0x729   :  { %1205 = vrot.lane.b32.xlu1 %v3523_v58, %s3222_s6 }
 0x72d   :  { %1270 = vrot.lane.b32.xlu1 %v3533_v29, %s3222_s6 }
 0x731   :  { %1320 = vrot.lane.b32.xlu1 %v3535_v16, %s3222_s6 }
 0x735   :  { %1318 = vrot.lane.b32.xlu1 %v3559_v19, %s3222_s6 }
 0x79d   :  { %v1135_v46 = vpop.xlane.xlu0 %1134 }
 0x79e   :  { %v1139_v47 = vsub.f32 %v1077_v14, %v1135_v46 }
 0x7a0   :  { %v1141_v48 = vmul.f32 1.442695, %v1139_v47 }
 0x7a1   :  { %v1138_v49 = vpop.xlane.xlu1 %1137 }
 0x7a2   :  { %3037 = vpow2.f32 %v1141_v48  ;;  %v1140_v50 = vsub.f32 %v1127_v38, %v1138_v49 }
 0x7a4   :  { %v1143_v51 = vmul.f32 1.442695, %v1140_v50 }
 0x7a5   :  { %v1206_v53 = vpop.permute.xlu1 %1205 }
 0x7a6   :  { %3039 = vpow2.f32 %v1143_v51  ;;  %v1211_v54 = vsel %vm705_vm3, %v1206_v53, 0 }
 0x7a7   :  { %2832 = vmatpush3.bf16.msra.mxu0 %v1211_v54 }
 0x7a8   :  { %2843 = vmatprep.subr.bf16.mxu0 %v3220_v45 }
 0x7a9   :  { %v1271_v2 = vpop.permute.xlu1 %1270 }
 0x7aa   :  { %v1276_v8 = vsel %vm585_vm2, %v1271_v2, 0 }
 0x7ad   :  { %v1321_v10 = vpop.permute.xlu1 %1320 }
 0x7ae   :  { %v1326_v12 = vsel %vm585_vm2, %v1321_v10, 0 }
 0x7af   :  { %v3038_v55 = vpop.eup %3037 }
 0x7b0   :  { %v1145_v56 = vsel %vm585_vm2, %v3038_v55, 0.0 }
 0x7b1   :  { %1146 = vadd.xlane.f32.xlu0 %v1145_v56  ;;  %v1319_v18 = vpop.permute.xlu1 %1318 }
 0x7b3   :  { %v3040_v57 = vpop.eup %3039 }
 0x7b4   :  { %v1148_v59 = vsel %vm585_vm2, %v3040_v57, 0.0 }
 0x7b5   :  { %1149 = vadd.xlane.f32.xlu0 %v1148_v59 }
 0x7cb   :  { %1157 = vrot.lane.b32.xlu0 %v3519_v52, %s3222_s6 }
 0x7cf   :  { %1268 = vrot.lane.b32.xlu0 %v3550_v35, %s3222_s6 }
 0x83a   :  { %v1147_v60 = vpop.xlane.xlu0 %1146 }
 0x83b   :  { %3041 = vrcp.f32 %v1147_v60 }
 0x83e   :  { %v1150_v62 = vpop.xlane.xlu0 %1149 }
 0x83f   :  { %3043 = vrcp.f32 %v1150_v62 }
 0x842   :  { %v1158_v63 = vpop.permute.xlu0 %1157 }
 0x843   :  { %v1163_v0 = vsel %vm705_vm3, %v1158_v63, 0 }
 0x844   :  { %2826 = vmatpush3.bf16.msra.mxu1 %v1163_v0 }
 0x845   :  { %2837 = vmatprep.subr.bf16.mxu1 %v3220_v45 }
 0x846   :  { %v1269_v17 = vpop.permute.xlu0 %1268 }
 0x848   :  { %v3042_v1 = vpop.eup %3041 }
 0x849   :  { %v1153_v5 = vmul.f32 %v3042_v1, %v3038_v55 }
 0x84b   :  { %v1155_v6 = vpack.c.bf16 %v1153_v5, %v1153_v5 }
 0x84c   :  { %v3044_v7 = vpop.eup %3043 }
 0x84d   :  { %2828 = vmatmul.mubr.msk.bf16.vlgmr.msra.gmra.mxu1 %vm585_vm2, %v1155_v6  ;;  %v1154_v9 = vmul.f32 %v3044_v7, %v3040_v57 }
 0x84e   :  { %2838 = vmatpush3.bf16.xpose.msra.mxu1 %v1276_v8  ;;  %2839 = vmatprep.mubr.msk.bf16.mxu1 %vm3221_vm1, %v3220_v45 }
 0x84f   :  { %v1156_v11 = vpack.c.bf16 %v1154_v9, %v1154_v9  ;;  %2849 = vmatprep.subr.bf16.mxu1 %v3220_v45 }
 0x851   :  { %2834 = vmatmul.mubr.msk.bf16.vlgmr.msra.gmra.mxu0 %vm585_vm2, %v1156_v11 }
 0x852   :  { %2844 = vmatpush3.bf16.xpose.msra.mxu0 %v1326_v12  ;;  %2845 = vmatprep.mubr.msk.bf16.mxu0 %vm3221_vm1, %v3220_v45 }
 0x853   :  { %2855 = vmatprep.subr.bf16.mxu0 %v3220_v45 }
 0x855   :  { %2840 = vmatmul.mubr.msk.bf16.vlgmr.msra.gmra.mxu1 %vm585_vm2, %v1269_v17 }
 0x856   :  { %2850 = vmatpush3.bf16.msra.mxu1 %v1163_v0  ;;  %2851 = vmatprep.mubr.msk.bf16.mxu1 %vm3221_vm1, %v3220_v45 }
 0x857   :  { %2861 = vmatprep.subr.bf16.mxu1 %v3220_v45 }
 0x859   :  { %2846 = vmatmul.mubr.msk.bf16.vlgmr.msra.gmra.mxu0 %vm585_vm2, %v1319_v18 }
 0x85a   :  { %2856 = vmatpush3.bf16.msra.mxu0 %v1211_v54  ;;  %2857 = vmatprep.mubr.msk.bf16.mxu0 %vm3221_vm1, %v3220_v45 }
 0x85b   :  { %2867 = vmatprep.subr.bf16.mxu0 %v3220_v45 }
 0x90d   :  { %v3637_v20 = vpop.f32.mrf.mxu1 }
 0x90f   :  { %v2829_v21 = vpop.f32.mrf.mxu1 }
 0x911   :  { %v1202_v22 = vpop.f32.mrf.mxu1  ;;  %v3639_v25 = vpop.f32.mrf.mxu0 }
 0x913   :  { %v2830_v26 = vpop.f32.mrf.mxu1  ;;  %v2835_v61 = vpop.f32.mrf.mxu0 }
 0x915   :  { %v1250_v27 = vpop.f32.mrf.mxu0  ;;  %v1312_v28 = vpop.f32.mrf.mxu1 }
 0x916   :  { %v1368_v31 = vsel %vm585_vm2, %v1312_v28, -inf }
 0x917   :  { %1369 = vmax.xlane.f32.xlu0 %v1368_v31  ;;  %v2836_v13 = vpop.f32.mrf.mxu0  ;;  %v2841_v32 = vpop.f32.mrf.mxu1 }
 0x919   :  { %v1315_v30 = vpop.f32.mrf.mxu1  ;;  %v1362_v14 = vpop.f32.mrf.mxu0 }
 0x91a   :  { %v1371_v34 = vsel %vm585_vm2, %v1362_v14, -inf }
 0x91b   :  { %v2842_v36 = vpop.f32.mrf.mxu1  ;;  %1372 = vmax.xlane.f32.xlu1 %v1371_v34  ;;  %v2847_v37 = vpop.f32.mrf.mxu0 }
 0x91d   :  { %v1365_v33 = vpop.f32.mrf.mxu0 }
 0x91f   :  { %v2848_v38 = vpop.f32.mrf.mxu0 }
 0x92c   :  { %1545 = vrot.lane.b32.xlu1 %v3497_v42, %s3223_s1 }
 0x930   :  { %1493 = vrot.lane.b32.xlu1 %v3502_v24, %s3223_s1 }
 0x934   :  { %1543 = vrot.lane.b32.xlu1 %v3509_v44, %s3223_s1 }
 0x9a0   :  { %v1370_v23 = vpop.xlane.xlu0 %1369 }
 0x9a1   :  { %v1374_v40 = vsub.f32 %v1312_v28, %v1370_v23 }
 0x9a3   :  { %v1376_v41 = vmul.f32 1.442695, %v1374_v40 }
 0x9a4   :  { %v1373_v43 = vpop.xlane.xlu1 %1372 }
 0x9a5   :  { %3045 = vpow2.f32 %v1376_v41  ;;  %v1375_v15 = vsub.f32 %v1362_v14, %v1373_v43 }
 0x9a7   :  { %v1378_v46 = vmul.f32 1.442695, %v1375_v15 }
 0x9a8   :  { %v1546_v60 = vpop.permute.xlu1 %1545 }
 0x9a9   :  { %3047 = vpow2.f32 %v1378_v46  ;;  %v1551_v1 = vsel %vm585_vm2, %v1546_v60, 0 }
 0x9ac   :  { %v1494_v2 = vpop.permute.xlu1 %1493 }
 0x9b0   :  { %v1544_v5 = vpop.permute.xlu1 %1543 }
 0x9b2   :  { %v3046_v47 = vpop.eup %3045 }
 0x9b3   :  { %v1380_v48 = vsel %vm585_vm2, %v3046_v47, 0.0 }
 0x9b4   :  { %1381 = vadd.xlane.f32.xlu0 %v1380_v48 }
 0x9b6   :  { %v3048_v49 = vpop.eup %3047 }
 0x9b7   :  { %v1383_v50 = vsel %vm585_vm2, %v3048_v49, 0.0 }
 0x9b8   :  { %1384 = vadd.xlane.f32.xlu0 %v1383_v50 }
 0x9ce   :  { %1495 = vrot.lane.b32.xlu0 %v3493_v39, %s3223_s1 }
 0xa3d   :  { %v1382_v51 = vpop.xlane.xlu0 %1381 }
 0xa3e   :  { %3049 = vrcp.f32 %v1382_v51 }
 0xa41   :  { %v1385_v53 = vpop.xlane.xlu0 %1384 }
 0xa42   :  { %3051 = vrcp.f32 %v1385_v53 }
 0xa45   :  { %v1496_v56 = vpop.permute.xlu0 %1495 }
 0xa46   :  { %v1501_v62 = vsel %vm585_vm2, %v1496_v56, 0 }
 0xa4b   :  { %v3050_v54 = vpop.eup %3049 }
 0xa4c   :  { %v1388_v55 = vmul.f32 %v3050_v54, %v3046_v47 }
 0xa4e   :  { %v1390_v57 = vpack.c.bf16 %v1388_v55, %v1388_v55 }
 0xa4f   :  { %v3052_v59 = vpop.eup %3051 }
 0xa50   :  { %2852 = vmatmul.mubr.msk.bf16.vlgmr.msra.gmra.mxu1 %vm585_vm2, %v1390_v57  ;;  %v1389_v63 = vmul.f32 %v3052_v59, %v3048_v49 }
 0xa51   :  { %2862 = vmatpush3.bf16.xpose.msra.mxu1 %v1501_v62  ;;  %2863 = vmatprep.mubr.msk.bf16.mxu1 %vm3221_vm1, %v3220_v45 }
 0xa52   :  { %v1391_v0 = vpack.c.bf16 %v1389_v63, %v1389_v63  ;;  %2873 = vmatprep.subr.bf16.mxu1 %v3220_v45 }
 0xa54   :  { %2858 = vmatmul.mubr.msk.bf16.vlgmr.msra.gmra.mxu0 %vm585_vm2, %v1391_v0 }
 0xa55   :  { %2868 = vmatpush3.bf16.xpose.msra.mxu0 %v1551_v1  ;;  %2869 = vmatprep.mubr.msk.bf16.mxu0 %vm3221_vm1, %v3220_v45 }
 0xa56   :  { %2879 = vmatprep.subr.bf16.mxu0 %v3220_v45 }
 0xa58   :  { %2864 = vmatmul.mubr.msk.bf16.vlgmr.msra.gmra.mxu1 %vm585_vm2, %v1494_v2 }
 0xa59   :  { %2875 = vmatprep.mubr.msk.bf16.mxu1 %vm3221_vm1, %v3220_v45 }
 0xa5c   :  { %2870 = vmatmul.mubr.msk.bf16.vlgmr.msra.gmra.mxu0 %vm585_vm2, %v1544_v5 }
 0xa5d   :  { %2881 = vmatprep.mubr.msk.bf16.mxu0 %vm3221_vm1, %v3220_v45 }
 0xb10   :  { %v3669_v6 = vpop.f32.mrf.mxu1 }
 0xb12   :  { %v2853_v7 = vpop.f32.mrf.mxu1 }
 0xb14   :  { %v1432_v8 = vpop.f32.mrf.mxu1  ;;  %v3671_v9 = vpop.f32.mrf.mxu0 }
 0xb16   :  { %v2854_v10 = vpop.f32.mrf.mxu1  ;;  %v2859_v11 = vpop.f32.mrf.mxu0 }
 0xb18   :  { %v1475_v12 = vpop.f32.mrf.mxu0  ;;  %v1537_v17 = vpop.f32.mrf.mxu1 }
 0xb19   :  { %v1593_v18 = vsel %vm585_vm2, %v1537_v17, -inf }
 0xb1a   :  { %1594 = vmax.xlane.f32.xlu0 %v1593_v18  ;;  %v2860_v21 = vpop.f32.mrf.mxu0  ;;  %v2865_v22 = vpop.f32.mrf.mxu1 }
 0xb1c   :  { %v1540_v26 = vpop.f32.mrf.mxu1  ;;  %v1587_v61 = vpop.f32.mrf.mxu0 }
 0xb1d   :  { %v1596_v27 = vsel %vm585_vm2, %v1587_v61, -inf }
 0xb1e   :  { %v2866_v28 = vpop.f32.mrf.mxu1  ;;  %1597 = vmax.xlane.f32.xlu1 %v1596_v27  ;;  %v2871_v31 = vpop.f32.mrf.mxu0 }
 0xb20   :  { %v1590_v13 = vpop.f32.mrf.mxu0 }
 0xb22   :  { %v2872_v32 = vpop.f32.mrf.mxu0 }
 0xb2f   :  { %1665 = vrot.lane.b32.xlu1 %v3523_v58, %s3223_s1 }
 0xb33   :  { %1730 = vrot.lane.b32.xlu1 %v3533_v29, %s3223_s1 }
 0xb37   :  { %1780 = vrot.lane.b32.xlu1 %v3535_v16, %s3223_s1 }
 0xb3b   :  { %1778 = vrot.lane.b32.xlu1 %v3559_v19, %s3223_s1 }
 0xba3   :  { %v1595_v30 = vpop.xlane.xlu0 %1594 }
 0xba4   :  { %v1599_v14 = vsub.f32 %v1537_v17, %v1595_v30 }
 0xba6   :  { %v1601_v34 = vmul.f32 1.442695, %v1599_v14 }
 0xba7   :  { %v1598_v36 = vpop.xlane.xlu1 %1597 }
 0xba8   :  { %3053 = vpow2.f32 %v1601_v34  ;;  %v1600_v37 = vsub.f32 %v1587_v61, %v1598_v36 }
 0xbaa   :  { %v1603_v33 = vmul.f32 1.442695, %v1600_v37 }
 0xbab   :  { %v1666_v38 = vpop.permute.xlu1 %1665 }
 0xbac   :  { %3055 = vpow2.f32 %v1603_v33  ;;  %v1671_v23 = vsel %vm705_vm3, %v1666_v38, 0 }
 0xbad   :  { %2880 = vmatpush3.bf16.msra.mxu0 %v1671_v23 }
 0xbae   :  { %2891 = vmatprep.subr.bf16.mxu0 %v3220_v45 }
 0xbaf   :  { %v1731_v51 = vpop.permute.xlu1 %1730 }
 0xbb0   :  { %v1736_v56 = vsel %vm585_vm2, %v1731_v51, 0 }
 0xbb3   :  { %v1781_v59 = vpop.permute.xlu1 %1780 }
 0xbb4   :  { %v1786_v62 = vsel %vm585_vm2, %v1781_v59, 0 }
 0xbb5   :  { %v3054_v40 = vpop.eup %3053 }
 0xbb6   :  { %v1605_v41 = vsel %vm585_vm2, %v3054_v40, 0.0 }
 0xbb7   :  { %1606 = vadd.xlane.f32.xlu0 %v1605_v41  ;;  %v1779_v0 = vpop.permute.xlu1 %1778 }
 0xbb9   :  { %v3056_v43 = vpop.eup %3055 }
 0xbba   :  { %v1608_v15 = vsel %vm585_vm2, %v3056_v43, 0.0 }
 0xbbb   :  { %1609 = vadd.xlane.f32.xlu0 %v1608_v15 }
 0xbd1   :  { %1617 = vrot.lane.b32.xlu0 %v3519_v52, %s3223_s1 }
 0xbd5   :  { %1728 = vrot.lane.b32.xlu0 %v3550_v35, %s3223_s1 }
 0xc40   :  { %v1607_v46 = vpop.xlane.xlu0 %1606 }
 0xc41   :  { %3057 = vrcp.f32 %v1607_v46 }
 0xc44   :  { %v1610_v47 = vpop.xlane.xlu0 %1609 }
 0xc45   :  { %3059 = vrcp.f32 %v1610_v47 }
 0xc48   :  { %v1618_v48 = vpop.permute.xlu0 %1617 }
 0xc49   :  { %v1623_v49 = vsel %vm705_vm3, %v1618_v48, 0 }
 0xc4a   :  { %2874 = vmatpush3.bf16.msra.mxu1 %v1623_v49 }
 0xc4b   :  { %2885 = vmatprep.subr.bf16.mxu1 %v3220_v45 }
 0xc4c   :  { %v1729_v63 = vpop.permute.xlu0 %1728 }
 0xc4e   :  { %v3058_v50 = vpop.eup %3057 }
 0xc4f   :  { %v1613_v53 = vmul.f32 %v3058_v50, %v3054_v40 }
 0xc51   :  { %v1615_v54 = vpack.c.bf16 %v1613_v53, %v1613_v53 }
 0xc52   :  { %v3060_v55 = vpop.eup %3059 }
 0xc53   :  { %2876 = vmatmul.mubr.msk.bf16.vlgmr.msra.gmra.mxu1 %vm585_vm2, %v1615_v54  ;;  %v1614_v57 = vmul.f32 %v3060_v55, %v3056_v43 }
 0xc54   :  { %2886 = vmatpush3.bf16.xpose.msra.mxu1 %v1736_v56  ;;  %2887 = vmatprep.mubr.msk.bf16.mxu1 %vm3221_vm1, %v3220_v45 }
 0xc55   :  { %v1616_v60 = vpack.c.bf16 %v1614_v57, %v1614_v57  ;;  %2897 = vmatprep.subr.bf16.mxu1 %v3220_v45 }
 0xc57   :  { %2882 = vmatmul.mubr.msk.bf16.vlgmr.msra.gmra.mxu0 %vm585_vm2, %v1616_v60 }
 0xc58   :  { %2892 = vmatpush3.bf16.xpose.msra.mxu0 %v1786_v62  ;;  %2893 = vmatprep.mubr.msk.bf16.mxu0 %vm3221_vm1, %v3220_v45 }
 0xc59   :  { %2903 = vmatprep.subr.bf16.mxu0 %v3220_v45 }
 0xc5b   :  { %2888 = vmatmul.mubr.msk.bf16.vlgmr.msra.gmra.mxu1 %vm585_vm2, %v1729_v63 }
 0xc5c   :  { %2898 = vmatpush3.bf16.msra.mxu1 %v1623_v49  ;;  %2899 = vmatprep.mubr.msk.bf16.mxu1 %vm3221_vm1, %v3220_v45 }
 0xc5d   :  { %2909 = vmatprep.subr.bf16.mxu1 %v3220_v45 }
 0xc5f   :  { %2894 = vmatmul.mubr.msk.bf16.vlgmr.msra.gmra.mxu0 %vm585_vm2, %v1779_v0 }
 0xc60   :  { %2904 = vmatpush3.bf16.msra.mxu0 %v1671_v23  ;;  %2905 = vmatprep.mubr.msk.bf16.mxu0 %vm3221_vm1, %v3220_v45 }
 0xc61   :  { %2915 = vmatprep.subr.bf16.mxu0 %v3220_v45 }
 0xd13   :  { %v3711_v1 = vpop.f32.mrf.mxu1 }
 0xd15   :  { %v2877_v2 = vpop.f32.mrf.mxu1 }
 0xd17   :  { %v1662_v5 = vpop.f32.mrf.mxu1  ;;  %v3713_v7 = vpop.f32.mrf.mxu0 }
 0xd19   :  { %v2878_v8 = vpop.f32.mrf.mxu1  ;;  %v2883_v10 = vpop.f32.mrf.mxu0 }
 0xd1b   :  { %v1710_v11 = vpop.f32.mrf.mxu0  ;;  %v1772_v12 = vpop.f32.mrf.mxu1 }
 0xd1c   :  { %v1828_v17 = vsel %vm585_vm2, %v1772_v12, -inf }
 0xd1d   :  { %1829 = vmax.xlane.f32.xlu0 %v1828_v17  ;;  %v2884_v18 = vpop.f32.mrf.mxu0  ;;  %v2889_v21 = vpop.f32.mrf.mxu1 }
 0xd1f   :  { %v1775_v22 = vpop.f32.mrf.mxu1  ;;  %v1822_v26 = vpop.f32.mrf.mxu0 }
 0xd20   :  { %v1831_v61 = vsel %vm585_vm2, %v1822_v26, -inf }
 0xd21   :  { %v2890_v27 = vpop.f32.mrf.mxu1  ;;  %1832 = vmax.xlane.f32.xlu1 %v1831_v61  ;;  %v2895_v28 = vpop.f32.mrf.mxu0 }
 0xd23   :  { %v1825_v31 = vpop.f32.mrf.mxu0 }
 0xd25   :  { %v2896_v13 = vpop.f32.mrf.mxu0 }
 0xd32   :  { %2005 = vrot.lane.b32.xlu1 %v3497_v42, %s3224_s14 }
 0xd36   :  { %1953 = vrot.lane.b32.xlu1 %v3502_v24, %s3224_s14 }
 0xd3a   :  { %2003 = vrot.lane.b32.xlu1 %v3509_v44, %s3224_s14 }
 0xda6   :  { %v1830_v32 = vpop.xlane.xlu0 %1829 }
 0xda7   :  { %v1834_v30 = vsub.f32 %v1772_v12, %v1830_v32 }
 0xda9   :  { %v1836_v14 = vmul.f32 1.442695, %v1834_v30 }
 0xdaa   :  { %v1833_v34 = vpop.xlane.xlu1 %1832 }
 0xdab   :  { %3061 = vpow2.f32 %v1836_v14  ;;  %v1835_v36 = vsub.f32 %v1822_v26, %v1833_v34 }
 0xdad   :  { %v1838_v37 = vmul.f32 1.442695, %v1835_v36 }
 0xdae   :  { %v2006_v47 = vpop.permute.xlu1 %2005 }
 0xdaf   :  { %3063 = vpow2.f32 %v1838_v37  ;;  %v2011_v50 = vsel %vm585_vm2, %v2006_v47, 0 }
 0xdb2   :  { %v1954_v51 = vpop.permute.xlu1 %1953 }
 0xdb6   :  { %v2004_v53 = vpop.permute.xlu1 %2003 }
 0xdb8   :  { %v3062_v33 = vpop.eup %3061 }
 0xdb9   :  { %v1840_v38 = vsel %vm585_vm2, %v3062_v33, 0.0 }
 0xdba   :  { %1841 = vadd.xlane.f32.xlu0 %v1840_v38 }
 0xdbc   :  { %v3064_v23 = vpop.eup %3063 }
 0xdbd   :  { %v1843_v42 = vsel %vm585_vm2, %v3064_v23, 0.0 }
 0xdbe   :  { %1844 = vadd.xlane.f32.xlu0 %v1843_v42 }
 0xdd4   :  { %1955 = vrot.lane.b32.xlu0 %v3493_v39, %s3224_s14 }
 0xe43   :  { %v1842_v24 = vpop.xlane.xlu0 %1841 }
 0xe44   :  { %3065 = vrcp.f32 %v1842_v24 }
 0xe47   :  { %v1845_v44 = vpop.xlane.xlu0 %1844 }
 0xe48   :  { %3067 = vrcp.f32 %v1845_v44 }
 0xe4b   :  { %v1956_v43 = vpop.permute.xlu0 %1955 }
 0xe4c   :  { %v1961_v48 = vsel %vm585_vm2, %v1956_v43, 0 }
 0xe51   :  { %v3066_v40 = vpop.eup %3065 }
 0xe52   :  { %v1848_v41 = vmul.f32 %v3066_v40, %v3062_v33 }
 0xe54   :  { %v1850_v15 = vpack.c.bf16 %v1848_v41, %v1848_v41 }
 0xe55   :  { %v3068_v46 = vpop.eup %3067 }
 0xe56   :  { %2900 = vmatmul.mubr.msk.bf16.vlgmr.msra.gmra.mxu1 %vm585_vm2, %v1850_v15  ;;  %v1849_v49 = vmul.f32 %v3068_v46, %v3064_v23 }
 0xe57   :  { %2910 = vmatpush3.bf16.xpose.msra.mxu1 %v1961_v48  ;;  %2911 = vmatprep.mubr.msk.bf16.mxu1 %vm3221_vm1, %v3220_v45 }
 0xe58   :  { %v1851_v39 = vpack.c.bf16 %v1849_v49, %v1849_v49  ;;  %2921 = vmatprep.subr.bf16.mxu1 %v3220_v45 }
 0xe5a   :  { %2906 = vmatmul.mubr.msk.bf16.vlgmr.msra.gmra.mxu0 %vm585_vm2, %v1851_v39 }
 0xe5b   :  { %2916 = vmatpush3.bf16.xpose.msra.mxu0 %v2011_v50  ;;  %2917 = vmatprep.mubr.msk.bf16.mxu0 %vm3221_vm1, %v3220_v45 }
 0xe5c   :  { %2927 = vmatprep.subr.bf16.mxu0 %v3220_v45 }
 0xe5e   :  { %2912 = vmatmul.mubr.msk.bf16.vlgmr.msra.gmra.mxu1 %vm585_vm2, %v1954_v51 }
 0xe5f   :  { %2923 = vmatprep.mubr.msk.bf16.mxu1 %vm3221_vm1, %v3220_v45 }
 0xe62   :  { %2918 = vmatmul.mubr.msk.bf16.vlgmr.msra.gmra.mxu0 %vm585_vm2, %v2004_v53 }
 0xe63   :  { %2929 = vmatprep.mubr.msk.bf16.mxu0 %vm3221_vm1, %v3220_v45 }
 0xf16   :  { %v3743_v54 = vpop.f32.mrf.mxu1 }
 0xf18   :  { %v2901_v55 = vpop.f32.mrf.mxu1 }
 0xf1a   :  { %v1892_v56 = vpop.f32.mrf.mxu1  ;;  %v3745_v57 = vpop.f32.mrf.mxu0 }
 0xf1c   :  { %v2902_v59 = vpop.f32.mrf.mxu1  ;;  %v2907_v60 = vpop.f32.mrf.mxu0 }
 0xf1e   :  { %v1935_v62 = vpop.f32.mrf.mxu0  ;;  %v1997_v63 = vpop.f32.mrf.mxu1 }
 0xf1f   :  { %v2053_v0 = vsel %vm585_vm2, %v1997_v63, -inf }
 0xf20   :  { %2054 = vmax.xlane.f32.xlu0 %v2053_v0  ;;  %v2908_v2 = vpop.f32.mrf.mxu0  ;;  %v2913_v5 = vpop.f32.mrf.mxu1 }
 0xf22   :  { %v2000_v8 = vpop.f32.mrf.mxu1  ;;  %v2047_v10 = vpop.f32.mrf.mxu0 }
 0xf23   :  { %v2056_v11 = vsel %vm585_vm2, %v2047_v10, -inf  ;;  %v2612_v8 = vpack.c.bf16 %v3597_v4, %v3597_v4  ;;  %v2618_v4 = vpack.c.bf16 %v3713_v7, %v3713_v7 }
 0xf24   :  { %v2914_v12 = vpop.f32.mrf.mxu1  ;;  %2057 = vmax.xlane.f32.xlu1 %v2056_v11  ;;  %v2919_v17 = vpop.f32.mrf.mxu0  ;;  %v2614_v11 = vpack.c.bf16 %v3639_v25, %v3639_v25 }
 0xf25   :  { %v2616_v12 = vpack.c.bf16 %v3671_v9, %v3671_v9 }
 0xf26   :  { %v2050_v18 = vpop.f32.mrf.mxu0 }
 0xf28   :  { %v2920_v21 = vpop.f32.mrf.mxu0 }
 0xf35   :  { %2125 = vrot.lane.b32.xlu1 %v3523_v58, %s3224_s14 }
 0xf39   :  { %2190 = vrot.lane.b32.xlu1 %v3533_v29, %s3224_s14 }
 0xf3d   :  { %2240 = vrot.lane.b32.xlu1 %v3535_v16, %s3224_s14 }
 0xf41   :  { %2238 = vrot.lane.b32.xlu1 %v3559_v19, %s3224_s14 }
 0xfa9   :  { %v2055_v22 = vpop.xlane.xlu0 %2054 }
 0xfaa   :  { %v2059_v26 = vsub.f32 %v1997_v63, %v2055_v22 }
 0xfac   :  { %v2061_v61 = vmul.f32 1.442695, %v2059_v26 }
 0xfad   :  { %v2058_v27 = vpop.xlane.xlu1 %2057 }
 0xfae   :  { %3069 = vpow2.f32 %v2061_v61  ;;  %v2060_v28 = vsub.f32 %v2047_v10, %v2058_v27  ;;  %v2613_v10 = vpack.c.bf16 %v3637_v20, %v3637_v20  ;;  %v2620_v20 = vpack.c.bf16 %v3745_v57, %v3745_v57 }
 0xfb0   :  { %v2063_v31 = vmul.f32 1.442695, %v2060_v28 }
 0xfb1   :  { %v2126_v13 = vpop.permute.xlu1 %2125 }
 0xfb2   :  { %3071 = vpow2.f32 %v2063_v31  ;;  %v2131_v58 = vsel %vm705_vm3, %v2126_v13, 0 }
 0xfb3   :  { %2928 = vmatpush3.bf16.msra.mxu0 %v2131_v58 }
 0xfb4   :  { %2939 = vmatprep.subr.bf16.mxu0 %v3220_v45 }
 0xfb5   :  { %v2191_v33 = vpop.permute.xlu1 %2190 }
 0xfb9   :  { %v2241_v24 = vpop.permute.xlu1 %2240 }
 0xfba   :  { %v2246_v40 = vsel %vm585_vm2, %v2241_v24, 0 }
 0xfbb   :  { %v3070_v29 = vpop.eup %3069 }
 0xfbc   :  { %v2065_v16 = vsel %vm585_vm2, %v3070_v29, 0.0 }
 0xfbd   :  { %2066 = vadd.xlane.f32.xlu0 %v2065_v16  ;;  %v2239_v43 = vpop.permute.xlu1 %2238 }
 0xfbf   :  { %v3072_v32 = vpop.eup %3071 }
 0xfc0   :  { %v2068_v19 = vsel %vm585_vm2, %v3072_v32, 0.0 }
 0xfc1   :  { %2069 = vadd.xlane.f32.xlu0 %v2068_v19  ;;  %v2611_v19 = vpack.c.bf16 %v3595_v3, %v3595_v3 }
 0xfd7   :  { %2077 = vrot.lane.b32.xlu0 %v3519_v52, %s3224_s14  ;;  %v2196_v52 = vsel %vm585_vm2, %v2191_v33, 0 }
 0xfdb   :  { %2188 = vrot.lane.b32.xlu0 %v3550_v35, %s3224_s14 }
0x1046   :  { %v2067_v30 = vpop.xlane.xlu0 %2066 }
0x1047   :  { %3073 = vrcp.f32 %v2067_v30  ;;  %v2615_v30 = vpack.c.bf16 %v3669_v6, %v3669_v6 }
0x104a   :  { %v2070_v14 = vpop.xlane.xlu0 %2069 }
0x104b   :  { %3075 = vrcp.f32 %v2070_v14  ;;  %v2617_v14 = vpack.c.bf16 %v3711_v1, %v3711_v1 }
0x104e   :  { %v2078_v34 = vpop.permute.xlu0 %2077 }
0x104f   :  { %v2083_v36 = vsel %vm705_vm3, %v2078_v34, 0  ;;  %v2619_v34 = vpack.c.bf16 %v3743_v54, %v3743_v54 }
0x1050   :  { %2922 = vmatpush3.bf16.msra.mxu1 %v2083_v36 }
0x1051   :  { %2933 = vmatprep.subr.bf16.mxu1 %v3220_v45 }
0x1052   :  { %v2189_v41 = vpop.permute.xlu0 %2188 }
0x1054   :  { %v3074_v37 = vpop.eup %3073 }
0x1055   :  { %v2073_v38 = vmul.f32 %v3074_v37, %v3070_v29 }
0x1057   :  { %v2075_v23 = vpack.c.bf16 %v2073_v38, %v2073_v38 }
0x1058   :  { %v3076_v42 = vpop.eup %3075 }
0x1059   :  { %2924 = vmatmul.mubr.msk.bf16.vlgmr.msra.gmra.mxu1 %vm585_vm2, %v2075_v23  ;;  %v2074_v35 = vmul.f32 %v3076_v42, %v3072_v32 }
0x105a   :  { %2934 = vmatpush3.bf16.xpose.msra.mxu1 %v2196_v52  ;;  %2935 = vmatprep.mubr.msk.bf16.mxu1 %vm3221_vm1, %v3220_v45 }
0x105b   :  { %v2076_v44 = vpack.c.bf16 %v2074_v35, %v2074_v35  ;;  %2945 = vmatprep.subr.bf16.mxu1 %v3220_v45 }
0x105d   :  { %2930 = vmatmul.mubr.msk.bf16.vlgmr.msra.gmra.mxu0 %vm585_vm2, %v2076_v44 }
0x105e   :  { %2940 = vmatpush3.bf16.xpose.msra.mxu0 %v2246_v40  ;;  %2941 = vmatprep.mubr.msk.bf16.mxu0 %vm3221_vm1, %v3220_v45  ;;  %v2996_v40 = vld [vmem:[%s3875_s8 + $0x18] sm:$0xff]  }
0x105f   :  { %2951 = vmatprep.subr.bf16.mxu0 %v3220_v45 }
0x1061   :  { %2936 = vmatmul.mubr.msk.bf16.vlgmr.msra.gmra.mxu1 %vm585_vm2, %v2189_v41  ;;  %v2997_v41 = vld [vmem:[%s3875_s8 + $0x10] sm:$0xff]  }
0x1062   :  { %2946 = vmatpush3.bf16.msra.mxu1 %v2083_v36  ;;  %2947 = vmatprep.mubr.msk.bf16.mxu1 %vm3221_vm1, %v3220_v45 }
0x1063   :  { %2957 = vmatprep.subr.bf16.mxu1 %v3220_v45 }
0x1065   :  { %2942 = vmatmul.mubr.msk.bf16.vlgmr.msra.gmra.mxu0 %vm585_vm2, %v2239_v43  ;;  %v2998_v43 = vld [vmem:[%s3875_s8 + $0x8] sm:$0xff]  }
0x1066   :  { %2952 = vmatpush3.bf16.msra.mxu0 %v2131_v58  ;;  %2953 = vmatprep.mubr.msk.bf16.mxu0 %vm3221_vm1, %v3220_v45 }
0x1119   :  { %v3784_v15 = vpop.f32.mrf.mxu1 }
0x111a   :  { %v2621_v3 = vpack.c.bf16 %v3784_v15, %v3784_v15  ;;  %v2999_v15 = vld [vmem:[%s3875_s8] sm:$0xff]  }
0x111b   :  { %v2925_v46 = vpop.f32.mrf.mxu1 }
0x111d   :  { %v2122_v47 = vpop.f32.mrf.mxu1  ;;  %v2167_v48 = vpop.f32.mrf.mxu0 }
0x111e   :  { %v2622_v25 = vpack.c.bf16 %v2167_v48, %v2167_v48 }
0x111f   :  { %v2926_v49 = vpop.f32.mrf.mxu1  ;;  %v2931_v39 = vpop.f32.mrf.mxu0 }
0x1121   :  { %v2170_v50 = vpop.f32.mrf.mxu0  ;;  %v2232_v51 = vpop.f32.mrf.mxu1 }
0x1122   :  { %v2288_v53 = vsel %vm585_vm2, %v2232_v51, -inf }
0x1123   :  { %2289 = vmax.xlane.f32.xlu0 %v2288_v53  ;;  %v2932_v55 = vpop.f32.mrf.mxu0  ;;  %v2937_v56 = vpop.f32.mrf.mxu1 }
0x1125   :  { %v2235_v59 = vpop.f32.mrf.mxu1  ;;  %v2282_v60 = vpop.f32.mrf.mxu0 }
0x1126   :  { %v2291_v62 = vsel %vm585_vm2, %v2282_v60, -inf }
0x1127   :  { %v2938_v63 = vpop.f32.mrf.mxu1  ;;  %2292 = vmax.xlane.f32.xlu1 %v2291_v62  ;;  %v2943_v0 = vpop.f32.mrf.mxu0  ;;  %v2423_v62 = vld [vmem:[%s3871_s4] sm:$0xff] }
0x1128   :  { %v2425_v63 = vmul.f32 2.0, %v2423_v62  ;;  %v2424_v0 = vld [vmem:[%s3871_s4 + $0x8] sm:$0xff] }
0x1129   :  { %v2285_v2 = vpop.f32.mrf.mxu0 }
0x112b   :  { %v2944_v5 = vpop.f32.mrf.mxu0 }
0x1138   :  { %1026 = vrot.lane.b32.xlu1 %v2612_v8, %s3225_s15  ;;  %v2426_v8 = vmul.f32 2.0, %v2424_v0 }
0x113c   :  { %1259 = vrot.lane.b32.xlu1 %v2613_v10, %s3226_s3 }
0x1140   :  { %1261 = vrot.lane.b32.xlu1 %v2614_v11, %s3226_s3 }
0x1144   :  { %1486 = vrot.lane.b32.xlu1 %v2616_v12, %s3227_s16 }
0x1148   :  { %1721 = vrot.lane.b32.xlu1 %v2618_v4, %s3228_s17 }
0x114c   :  { %1946 = vrot.lane.b32.xlu1 %v2620_v20, %s3229_s18 }
0x1150   :  { %2181 = vrot.lane.b32.xlu1 %v2622_v25, %s3230_s19 }
0x11ac   :  { %v2290_v9 = vpop.xlane.xlu0 %2289 }
0x11ad   :  { %v2294_v17 = vsub.f32 %v2232_v51, %v2290_v9 }
0x11af   :  { %v2296_v18 = vmul.f32 1.442695, %v2294_v17 }
0x11b0   :  { %v2293_v21 = vpop.xlane.xlu1 %2292 }
0x11b1   :  { %3077 = vpow2.f32 %v2296_v18  ;;  %v2295_v22 = vsub.f32 %v2282_v60, %v2293_v21 }
0x11b3   :  { %v2298_v7 = vmul.f32 1.442695, %v2295_v22 }
0x11b4   :  { %v1027_v26 = vpop.permute.xlu1 %1026 }
0x11b5   :  { %3079 = vpow2.f32 %v2298_v7  ;;  %1032 = vst.msk [vmem:[#allocation2 + $0x4] sm:$0xf] %vm1030_vm5, %v1027_v26 }
0x11b8   :  { %v1260_v57 = vpop.permute.xlu1 %1259 }
0x11bc   :  { %v1262_v61 = vpop.permute.xlu1 %1261 }
0x11bd   :  { %1267 = vst.msk [vmem:[#allocation2 + $0x4] sm:$0xf] %vm1265_vm6, %v1262_v61 }
0x11be   :  { %v3078_v27 = vpop.eup %3077 }
0x11bf   :  { %v2300_v28 = vsel %vm585_vm2, %v3078_v27, 0.0 }
0x11c0   :  { %2301 = vadd.xlane.f32.xlu0 %v2300_v28  ;;  %v1487_v31 = vpop.permute.xlu1 %1486 }
0x11c1   :  { %1492 = vst.msk [vmem:[#allocation2 + $0x4] sm:$0xf] %vm1490_vm7, %v1487_v31 }
0x11c2   :  { %v3080_v13 = vpop.eup %3079 }
0x11c3   :  { %v2303_v58 = vsel %vm585_vm2, %v3080_v13, 0.0 }
0x11c4   :  { %2304 = vadd.xlane.f32.xlu0 %v2303_v58  ;;  %v1722_v29 = vpop.permute.xlu1 %1721 }
0x11c5   :  { %1727 = vst.msk [vmem:[#allocation2 + $0x4] sm:$0xf] %vm1725_vm8, %v1722_v29 }
0x11c8   :  { %v1947_v16 = vpop.permute.xlu1 %1946 }
0x11c9   :  { %1952 = vst.msk [vmem:[#allocation2 + $0x4] sm:$0xf] %vm1950_vm9, %v1947_v16 }
0x11cc   :  { %v2182_v32 = vpop.permute.xlu1 %2181 }
0x11cd   :  { %2187 = vst.msk [vmem:[#allocation2 + $0x4] sm:$0xf] %vm2185_vm10, %v2182_v32 }
0x11da   :  { %1024 = vrot.lane.b32.xlu0 %v2611_v19, %s3225_s15 }
0x11de   :  { %1484 = vrot.lane.b32.xlu0 %v2615_v30, %s3227_s16 }
0x11e2   :  { %1719 = vrot.lane.b32.xlu0 %v2617_v14, %s3228_s17 }
0x11e6   :  { %1944 = vrot.lane.b32.xlu0 %v2619_v34, %s3229_s18 }
0x11ea   :  { %2179 = vrot.lane.b32.xlu0 %v2621_v3, %s3230_s19 }
0x1249   :  { %v2302_v36 = vpop.xlane.xlu0 %2301 }
0x124a   :  { %3081 = vrcp.f32 %v2302_v36 }
0x124d   :  { %v2305_v6 = vpop.xlane.xlu0 %2304 }
0x124e   :  { %3083 = vrcp.f32 %v2305_v6 }
0x1251   :  { %v1025_v37 = vpop.permute.xlu0 %1024 }
0x1252   :  { %1031 = vst.msk [vmem:[#allocation2] sm:$0xf] %vm1030_vm5, %v1025_v37 }
0x1253   :  { %1266 = vst.msk [vmem:[#allocation2] sm:$0xf] %vm1265_vm6, %v1260_v57 }
0x1255   :  { %v1485_v1 = vpop.permute.xlu0 %1484 }
0x1256   :  { %1491 = vst.msk [vmem:[#allocation2] sm:$0xf] %vm1490_vm7, %v1485_v1 }
0x1257   :  { %v3082_v54 = vpop.eup %3081 }
0x1258   :  { %v2308_v33 = vmul.f32 %v3082_v54, %v3078_v27 }
0x1259   :  { %v1720_v38 = vpop.permute.xlu0 %1719 }
0x125a   :  { %1726 = vst.msk [vmem:[#allocation2] sm:$0xf] %vm1725_vm8, %v1720_v38  ;;  %v2310_v23 = vpack.c.bf16 %v2308_v33, %v2308_v33 }
0x125b   :  { %v3084_v42 = vpop.eup %3083 }
0x125c   :  { %2948 = vmatmul.mubr.msk.bf16.vlgmr.msra.gmra.mxu1 %vm585_vm2, %v2310_v23  ;;  %v2309_v52 = vmul.f32 %v3084_v42, %v3080_v13 }
0x125d   :  { %v1945_v35 = vpop.permute.xlu0 %1944  ;;  %2965 = vmatprep.mubr.msk.bf16.mxu1 %vm3221_vm1, %v3220_v45  ;;  %2958 = vmatpush3.bf16.msra.mxu1 %v2996_v40 }
0x125e   :  { %1951 = vst.msk [vmem:[#allocation2] sm:$0xf] %vm1950_vm9, %v1945_v35  ;;  %v2311_v24 = vpack.c.bf16 %v2309_v52, %v2309_v52  ;;  %2959 = vmatprep.subr.bf16.mxu1 %v3220_v45 }
0x1260   :  { %2954 = vmatmul.mubr.msk.bf16.vlgmr.msra.gmra.mxu0 %vm585_vm2, %v2311_v24 }
0x1261   :  { %v2180_v44 = vpop.permute.xlu0 %2179  ;;  %2960 = vmatpush3.bf16.msra.mxu1 %v2997_v41 }
0x1262   :  { %2186 = vst.msk [vmem:[#allocation2] sm:$0xf] %vm2185_vm10, %v2180_v44  ;;  %2961 = vmatprep.subr.bf16.mxu1 %v3220_v45 }
0x1265   :  { %2962 = vmatpush3.bf16.msra.mxu1 %v2998_v43 }
0x1266   :  { %2963 = vmatprep.subr.bf16.mxu1 %v3220_v45 }
0x1269   :  { %2964 = vmatpush3.bf16.msra.mxu1 %v2999_v15 }
0x131c   :  { %v2349_v46 = vpop.f32.mrf.mxu1 }
0x131d   :  { %v2623_v47 = vpack.c.bf16 %v2349_v46, %v2349_v46 }
0x131e   :  { %v2949_v48 = vpop.f32.mrf.mxu1 }
0x131f   :  { %2404 = vrot.lane.b32.xlu0 %v2623_v47, %s3231_s25 }
0x1320   :  { %v2352_v49 = vpop.f32.mrf.mxu1  ;;  %v2392_v39 = vpop.f32.mrf.mxu0 }
0x1321   :  { %v2624_v50 = vpack.c.bf16 %v2392_v39, %v2392_v39 }
0x1322   :  { %v2950_v51 = vpop.f32.mrf.mxu1  ;;  %v2955_v53 = vpop.f32.mrf.mxu0 }
0x1323   :  { %2406 = vrot.lane.b32.xlu1 %v2624_v50, %s3231_s25 }
0x1324   :  { %v2395_v55 = vpop.f32.mrf.mxu0 }
0x1326   :  { %v2956_v56 = vpop.f32.mrf.mxu0 }
0x1391   :  { %v2405_v59 = vpop.permute.xlu0 %2404 }
0x1392   :  { %2411 = vst.msk [vmem:[#allocation2] sm:$0xf] %vm2410_vm11, %v2405_v59 }
0x1395   :  { %v2407_v60 = vpop.permute.xlu1 %2406 }
0x1396   :  { %2412 = vst.msk [vmem:[#allocation2 + $0x4] sm:$0xf] %vm2410_vm11, %v2407_v60 }
0x139d   :  { %v3000_v45 = vld [vmem:[#allocation2] sm:$0xff]  }
0x139e   :  { %2966 = vmatmul.mubr.msk.bf16.vlgmr.msra.gmra.mxu1 %vm2456_vm12, %v3000_v45 }
0x145e   :  { %v2494_v2 = vpop.f32.mrf.mxu1 }
0x145f   :  { %v2495_v5 = vadd.f32 %v2494_v2, %v2425_v63 }
0x1460   :  { %v2967_v10 = vpop.f32.mrf.mxu1 }
0x1461   :  { %2501 = vst.msk [vmem:[#allocation12] sm:$0xff] %vm114_vm0, %v2495_v5 }
0x1462   :  { %v2497_v11 = vpop.f32.mrf.mxu1 }
0x1463   :  { %v2498_v12 = vadd.f32 %v2497_v11, %v2426_v8 }
0x1464   :  { %v2968_v4 = vpop.f32.mrf.mxu1 }
0x1465   :  { %2502 = vst.msk [vmem:[#allocation12 + $0x8] sm:$0xff] %vm114_vm0, %v2498_v12 }
0x1466   :  { %3196 = shalt.err (!%p3193_p1)
}
0x1467   :  { %s3233_s4 = smov 128  }
0x1468   :  { %2514 = dma.vmem_to_hbm [thread:$0]  %s2509_s9, 256, %s3878_s11, [#allocation5], %s3233_s4, %s3233_s4, %s3226_s3  }
0x1469   :  { %3211 = dma.done.wait [#allocation5], 256  }
0x146a   :  { %3212 = vsyncadd [#allocation5], 4294967040 }
0x146b   :  { %2518 = vsyncpa [#allocation4], 1 }
0x146c   :  { %2519 = vsyncpa [#allocation7], 1 }
0x146d   :  { %2520 = vsyncpa [#allocation10], 1 }
0x146e   :  { %2521 = vsyncpa [#allocation5], 1 }

</bundles_post_ra>
